<compile_context>
chip_gen: v5e
topology: v5e:2x2
jax: 0.10.0
libtpu: 0.0.40
codegen_flags: <defaults>
</compile_context>

<pallas_src>
import functools

import jax
import jax.numpy as jnp
from jax.experimental import pallas as pl
from jax.experimental.pallas import tpu as pltpu


# ----------------------------------------------------------------------------
# Kernels.  Each kernel gets one (tb, C) tile of x and the full (C, C) weights
# / (1, C) biases resident in VMEM, and fuses the whole matmul+bias+ReLU chain.
# Matmul inputs are in the weights' dtype (bf16 by default); accumulation,
# bias add and ReLU are f32.
# ----------------------------------------------------------------------------

def _full_kernel(x_ref, w1_ref, b1_ref, w2_ref, b2_ref, w3_ref, b3_ref, o_ref):
    # coder == 0 : decoder(encoder(x))
    cdt = w1_ref.dtype
    x = x_ref[...]
    h = jnp.dot(x, w1_ref[...], preferred_element_type=jnp.float32)
    h = jnp.maximum(h + b1_ref[...], 0.0)                      # encoder ReLU (f32)
    z = jnp.dot(h.astype(cdt), w2_ref[...], preferred_element_type=jnp.float32)
    z = z + b2_ref[...]
    y = jnp.dot(z.astype(cdt), w3_ref[...], preferred_element_type=jnp.float32)
    y = jnp.maximum(y + b3_ref[...], 0.0)                      # decoder ReLU (f32)
    o_ref[...] = y.astype(o_ref.dtype)


def _encoder_kernel(x_ref, w1_ref, b1_ref, w2_ref, b2_ref, o_ref):
    # coder == 2 : encoder(x)
    cdt = w1_ref.dtype
    x = x_ref[...]
    h = jnp.dot(x, w1_ref[...], preferred_element_type=jnp.float32)
    h = jnp.maximum(h + b1_ref[...], 0.0)
    z = jnp.dot(h.astype(cdt), w2_ref[...], preferred_element_type=jnp.float32)
    z = z + b2_ref[...]
    o_ref[...] = z.astype(o_ref.dtype)


def _decoder_kernel(x_ref, w3_ref, b3_ref, o_ref):
    # coder == 1 : decoder(x)
    x = x_ref[...]
    y = jnp.dot(x, w3_ref[...], preferred_element_type=jnp.float32)
    y = jnp.maximum(y + b3_ref[...], 0.0)
    o_ref[...] = y.astype(o_ref.dtype)


# ----------------------------------------------------------------------------
# Parameter initialization (deterministic, PyTorch-Linear-style uniform) and
# one-time layout / dtype preparation.
# ----------------------------------------------------------------------------

def init_params(code_length, key):
    """Returns dict of weights (out, in) and biases (out,), like nn.Linear."""
    bound = 1.0 / jnp.sqrt(jnp.float32(code_length))
    keys = jax.random.split(key, 6)

    def u(k, shape):
        return jax.random.uniform(k, shape, jnp.float32, -bound, bound)

    return {
        "w1": u(keys[0], (code_length, code_length)),
        "b1": u(keys[1], (code_length,)),
        "w2": u(keys[2], (code_length, code_length)),
        "b2": u(keys[3], (code_length,)),
        "w3": u(keys[4], (code_length, code_length)),
        "b3": u(keys[5], (code_length,)),
    }


def prepare_params(params, use_bf16=True):
    """One-time layout prep: (out,in) -> (in,out) weights (optionally bf16),
    biases reshaped to (1, C) f32.  Done OUTSIDE the jitted forward so no
    per-call transpose / cast traffic is emitted."""
    C = params["w1"].shape[0]
    wdt = jnp.bfloat16 if use_bf16 else params["w1"].dtype
    return {
        "w1t": jnp.asarray(params["w1"].T, dtype=wdt),
        "w2t": jnp.asarray(params["w2"].T, dtype=wdt),
        "w3t": jnp.asarray(params["w3"].T, dtype=wdt),
        "b1": params["b1"].reshape(1, C).astype(jnp.float32),
        "b2": params["b2"].reshape(1, C).astype(jnp.float32),
        "b3": params["b3"].reshape(1, C).astype(jnp.float32),
    }


def _round_up(x, m):
    return ((x + m - 1) // m) * m


# ----------------------------------------------------------------------------
# Wrapper: tiles over the batch dim, keeps weights block-constant per tile.
# ----------------------------------------------------------------------------

@functools.partial(jax.jit, static_argnames=("coder", "tile_b"))
def autocoder_su_forward(x, params, coder=0, tile_b=256):
    B, C = x.shape
    out_dtype = x.dtype
    cdt = params["w1t"].dtype           # matmul-input dtype (bf16 by default)

    # Large, sublane-aligned batch tile; pad B up to a multiple of it so any
    # batch size gets the performance-optimal tile (padded rows discarded).
    tb = _round_up(min(tile_b, _round_up(B, 8)), 8)
    B_pad = _round_up(B, tb)

    xp = x.astype(cdt)
    if B_pad != B:
        xp = jnp.pad(xp, ((0, B_pad - B), (0, 0)))

    x_spec = pl.BlockSpec((tb, C), lambda i: (i, 0))
    w_spec = pl.BlockSpec((C, C), lambda i: (0, 0))   # constant -> not re-fetched
    b_spec = pl.BlockSpec((1, C), lambda i: (0, 0))
    o_spec = pl.BlockSpec((tb, C), lambda i: (i, 0))
    out_shape = jax.ShapeDtypeStruct((B_pad, C), out_dtype)
    grid = (B_pad // tb,)
    cparams = pltpu.CompilerParams(
        dimension_semantics=("parallel",),      # megacore shards the batch axis
        vmem_limit_bytes=48 * 1024 * 1024,      # <= v7x 64 MiB physical VMEM
    )

    if coder == 0:
        out = pl.pallas_call(
            _full_kernel,
            out_shape=out_shape,
            grid=grid,
            in_specs=[x_spec, w_spec, b_spec, w_spec, b_spec, w_spec, b_spec],
            out_specs=o_spec,
            compiler_params=cparams,
        )(xp, params["w1t"], params["b1"], params["w2t"], params["b2"],
          params["w3t"], params["b3"])
    elif coder == 1:
        out = pl.pallas_call(
            _decoder_kernel,
            out_shape=out_shape,
            grid=grid,
            in_specs=[x_spec, w_spec, b_spec],
            out_specs=o_spec,
            compiler_params=cparams,
        )(xp, params["w3t"], params["b3"])
    else:
        out = pl.pallas_call(
            _encoder_kernel,
            out_shape=out_shape,
            grid=grid,
            in_specs=[x_spec, w_spec, b_spec, w_spec, b_spec],
            out_specs=o_spec,
            compiler_params=cparams,
        )(xp, params["w1t"], params["b1"], params["w2t"], params["b2"])

    return out[:B] if B_pad != B else out


# ----------------------------------------------------------------------------
# Pure-JAX reference for correctness checking (mirrors the kernel's bf16
# matmul inputs / f32 accumulation so tolerances stay tight).
# ----------------------------------------------------------------------------

def _ref_forward(x, p, coder=0, use_bf16=True):
    cdt = jnp.bfloat16 if use_bf16 else x.dtype

    def lin(v, w, b):
        return jnp.dot(v.astype(cdt), w.T.astype(cdt),
                       preferred_element_type=jnp.float32) + b

    def enc(v):
        h = jnp.maximum(lin(v, p["w1"], p["b1"]), 0.0)
        return lin(h, p["w2"], p["b2"])

    def dec(v):
        return jnp.maximum(lin(v, p["w3"], p["b3"]), 0.0)

    if coder == 0:
        return dec(enc(x))
    elif coder == 1:
        return dec(x)
    else:
        return enc(x)


if __name__ == "__main__":
    code_length = 256   # feature dim (lane-aligned, 256 fills v6e/v7x MXU N/K)
    batch = 512         # -> grid of 2 tiles of 256: both v7x cores get work

    key = jax.random.PRNGKey(0)
    k_x, k_p = jax.random.split(key)
    x = jax.random.normal(k_x, (batch, code_length), jnp.float32)
    raw_params = init_params(code_length, k_p)
    params = prepare_params(raw_params, use_bf16=True)

    # coder = 0 (default forward path): decoder(encoder(x))
    out = jax.block_until_ready(autocoder_su_forward(x, params, coder=0))
    ref0 = _ref_forward(x, raw_params, coder=0, use_bf16=True)
    assert out.shape == (batch, code_length)
    assert out.dtype == x.dtype
    assert jnp.allclose(out, ref0, atol=1e-2, rtol=1e-2), "mismatch vs reference (coder=0)"

    # other two branches
    for c in (1, 2):
        o = jax.block_until_ready(autocoder_su_forward(x, params, coder=c))
        r = _ref_forward(x, raw_params, coder=c, use_bf16=True)
        assert jnp.allclose(o, r, atol=1e-2, rtol=1e-2), f"mismatch vs reference (coder={c})"

    # ragged batch exercising the pad-and-slice path (no divisibility assert)
    x_r = x[:37]
    o_r = jax.block_until_ready(autocoder_su_forward(x_r, params, coder=0))
    assert o_r.shape == (37, code_length)
    assert jnp.allclose(o_r, ref0[:37], atol=1e-2, rtol=1e-2), "mismatch on ragged batch"

    print("KERNEL_OK")
</pallas_src>

<mosaic_0001>
module attributes {stable_mosaic.version = 11 : i64} {
  func.func @_full_kernel(%arg0: i32, %arg1: memref<256x256xbf16, #tpu.memory_space<vmem>>, %arg2: memref<256x256xbf16, #tpu.memory_space<vmem>>, %arg3: memref<1x256xf32, #tpu.memory_space<vmem>>, %arg4: memref<256x256xbf16, #tpu.memory_space<vmem>>, %arg5: memref<1x256xf32, #tpu.memory_space<vmem>>, %arg6: memref<256x256xbf16, #tpu.memory_space<vmem>>, %arg7: memref<1x256xf32, #tpu.memory_space<vmem>>, %arg8: memref<256x256xf32, #tpu.memory_space<vmem>>) attributes {dimension_semantics = [#tpu.dimension_semantics<parallel>], iteration_bounds = array<i64: 2>, scalar_prefetch = 0 : i64, scratch_operands = 0 : i64, tpu.core_type = #tpu.core_type<tc>, window_params = [{transform_indices = @transform_0, window_bounds = array<i64: 256, 256>}, {pipeline_mode = #tpu.pipeline_mode<synchronous>, transform_indices = @transform_1, window_bounds = array<i64: 256, 256>}, {pipeline_mode = #tpu.pipeline_mode<synchronous>, transform_indices = @transform_2, window_bounds = array<i64: 1, 256>}, {pipeline_mode = #tpu.pipeline_mode<synchronous>, transform_indices = @transform_3, window_bounds = array<i64: 256, 256>}, {pipeline_mode = #tpu.pipeline_mode<synchronous>, transform_indices = @transform_4, window_bounds = array<i64: 1, 256>}, {pipeline_mode = #tpu.pipeline_mode<synchronous>, transform_indices = @transform_5, window_bounds = array<i64: 256, 256>}, {pipeline_mode = #tpu.pipeline_mode<synchronous>, transform_indices = @transform_6, window_bounds = array<i64: 1, 256>}, {transform_indices = @transform_7, window_bounds = array<i64: 256, 256>}]} {
    %c0 = arith.constant 0 : index
    %c0_0 = arith.constant 0 : index
    %0 = vector.load %arg1[%c0, %c0_0] : memref<256x256xbf16, #tpu.memory_space<vmem>>, vector<256x256xbf16>
    %c0_1 = arith.constant 0 : index
    %c0_2 = arith.constant 0 : index
    %1 = vector.load %arg2[%c0_1, %c0_2] : memref<256x256xbf16, #tpu.memory_space<vmem>>, vector<256x256xbf16>
    %cst = arith.constant dense<0.000000e+00> : vector<256x256xf32>
    %2 = tpu.matmul %0, %1, %cst {dimension_numbers = #tpu.dot_dimension_numbers<[1], [0], [0], [1], [0, 0, 1, 1], [], []>} : vector<256x256xbf16>, vector<256x256xbf16>, vector<256x256xf32> -> vector<256x256xf32>
    %c0_3 = arith.constant 0 : index
    %c0_4 = arith.constant 0 : index
    %3 = vector.load %arg3[%c0_3, %c0_4] : memref<1x256xf32, #tpu.memory_space<vmem>>, vector<1x256xf32>
    %4 = vector.broadcast %3 : vector<1x256xf32> to vector<256x256xf32>
    %5 = arith.addf %2, %4 : vector<256x256xf32>
    %cst_5 = arith.constant 0.000000e+00 : f32
    %6 = vector.broadcast %cst_5 : f32 to vector<256x256xf32>
    %7 = arith.maximumf %5, %6 : vector<256x256xf32>
    %8 = arith.truncf %7 : vector<256x256xf32> to vector<256x256xbf16>
    %c0_6 = arith.constant 0 : index
    %c0_7 = arith.constant 0 : index
    %9 = vector.load %arg4[%c0_6, %c0_7] : memref<256x256xbf16, #tpu.memory_space<vmem>>, vector<256x256xbf16>
    %cst_8 = arith.constant dense<0.000000e+00> : vector<256x256xf32>
    %10 = tpu.matmul %8, %9, %cst_8 {dimension_numbers = #tpu.dot_dimension_numbers<[1], [0], [0], [1], [0, 0, 1, 1], [], []>} : vector<256x256xbf16>, vector<256x256xbf16>, vector<256x256xf32> -> vector<256x256xf32>
    %c0_9 = arith.constant 0 : index
    %c0_10 = arith.constant 0 : index
    %11 = vector.load %arg5[%c0_9, %c0_10] : memref<1x256xf32, #tpu.memory_space<vmem>>, vector<1x256xf32>
    %12 = vector.broadcast %11 : vector<1x256xf32> to vector<256x256xf32>
    %13 = arith.addf %10, %12 : vector<256x256xf32>
    %14 = arith.truncf %13 : vector<256x256xf32> to vector<256x256xbf16>
    %c0_11 = arith.constant 0 : index
    %c0_12 = arith.constant 0 : index
    %15 = vector.load %arg6[%c0_11, %c0_12] : memref<256x256xbf16, #tpu.memory_space<vmem>>, vector<256x256xbf16>
    %cst_13 = arith.constant dense<0.000000e+00> : vector<256x256xf32>
    %16 = tpu.matmul %14, %15, %cst_13 {dimension_numbers = #tpu.dot_dimension_numbers<[1], [0], [0], [1], [0, 0, 1, 1], [], []>} : vector<256x256xbf16>, vector<256x256xbf16>, vector<256x256xf32> -> vector<256x256xf32>
    %c0_14 = arith.constant 0 : index
    %c0_15 = arith.constant 0 : index
    %17 = vector.load %arg7[%c0_14, %c0_15] : memref<1x256xf32, #tpu.memory_space<vmem>>, vector<1x256xf32>
    %18 = vector.broadcast %17 : vector<1x256xf32> to vector<256x256xf32>
    %19 = arith.addf %16, %18 : vector<256x256xf32>
    %cst_16 = arith.constant 0.000000e+00 : f32
    %20 = vector.broadcast %cst_16 : f32 to vector<256x256xf32>
    %21 = arith.maximumf %19, %20 : vector<256x256xf32>
    %c0_17 = arith.constant 0 : index
    %c0_18 = arith.constant 0 : index
    %22 = vector.load %arg8[%c0_17, %c0_18] : memref<256x256xf32, #tpu.memory_space<vmem>>, vector<256x256xf32>
    tpu.vector_store %arg8[%c0_17, %c0_18], %21 {strides = array<i32>} : memref<256x256xf32, #tpu.memory_space<vmem>>, vector<256x256xf32>,
    return
  }
  func.func @transform_0(%arg0: i32) -> (i32, i32) {
    %c0_i32 = arith.constant 0 : i32
    %c0_i32_0 = arith.constant 0 : i32
    return %arg0, %c0_i32 : i32, i32
  }
  func.func @transform_1(%arg0: i32) -> (i32, i32) {
    %c0_i32 = arith.constant 0 : i32
    %c0_i32_0 = arith.constant 0 : i32
    %c0_i32_1 = arith.constant 0 : i32
    return %c0_i32, %c0_i32_0 : i32, i32
  }
  func.func @transform_2(%arg0: i32) -> (i32, i32) {
    %c0_i32 = arith.constant 0 : i32
    %c0_i32_0 = arith.constant 0 : i32
    %c0_i32_1 = arith.constant 0 : i32
    return %c0_i32, %c0_i32_0 : i32, i32
  }
  func.func @transform_3(%arg0: i32) -> (i32, i32) {
    %c0_i32 = arith.constant 0 : i32
    %c0_i32_0 = arith.constant 0 : i32
    %c0_i32_1 = arith.constant 0 : i32
    return %c0_i32, %c0_i32_0 : i32, i32
  }
  func.func @transform_4(%arg0: i32) -> (i32, i32) {
    %c0_i32 = arith.constant 0 : i32
    %c0_i32_0 = arith.constant 0 : i32
    %c0_i32_1 = arith.constant 0 : i32
    return %c0_i32, %c0_i32_0 : i32, i32
  }
  func.func @transform_5(%arg0: i32) -> (i32, i32) {
    %c0_i32 = arith.constant 0 : i32
    %c0_i32_0 = arith.constant 0 : i32
    %c0_i32_1 = arith.constant 0 : i32
    return %c0_i32, %c0_i32_0 : i32, i32
  }
  func.func @transform_6(%arg0: i32) -> (i32, i32) {
    %c0_i32 = arith.constant 0 : i32
    %c0_i32_0 = arith.constant 0 : i32
    %c0_i32_1 = arith.constant 0 : i32
    return %c0_i32, %c0_i32_0 : i32, i32
  }
  func.func @transform_7(%arg0: i32) -> (i32, i32) {
    %c0_i32 = arith.constant 0 : i32
    %c0_i32_0 = arith.constant 0 : i32
    return %arg0, %c0_i32 : i32, i32
  }
}

</mosaic_0001>

<bundles_post_ra>
// kernel: autocoder_su_forward.1
= control target key start
LH: loop header
LB: loop body
LE: loop exit
PB: predicated region body
PF: predicated region fallthrough
CT: control target
= control target key end

     0   :  { %12 = vsyncpa [#allocation3], 0  ;;  %s4542_s0 = inlined_call_operand.vmem [shape: bf16[512,256], index: 0, kind: input, shape index: {}]   ;;  %s4543_s1 = inlined_call_operand.vmem [shape: bf16[256,256], index: 1, kind: input, shape index: {}]   ;;  %s4544_s2 = inlined_call_operand.vmem [shape: f32[1,256], index: 2, kind: input, shape index: {}]   ;;  %s4545_s3 = inlined_call_operand.vmem [shape: bf16[256,256], index: 3, kind: input, shape index: {}]   ;;  %s4546_s4 = inlined_call_operand.vmem [shape: f32[1,256], index: 4, kind: input, shape index: {}]   ;;  %s4547_s5 = inlined_call_operand.vmem [shape: bf16[256,256], index: 5, kind: input, shape index: {}]   ;;  %s4548_s6 = inlined_call_operand.vmem [shape: f32[1,256], index: 6, kind: input, shape index: {}]   ;;  %s4549_s7 = inlined_call_operand.hbm [shape: f32[512,256], index: 7, kind: output, shape index: {}]  }
   0x1   :  { %14 = vsyncpa [#allocation3 + $0x1], 0  ;;  %s3276_s24 = smov 0   ;;  %s3278_s25 = smov 0  }
   0x2   :  { %s3280_s26 = smov 0   ;;  %s3282_s27 = smov 0  }
   0x3 LB: > { %s3297_s28 = sadd.s32 4294967295, %s3232_s27   ;;  %s2472_s29 = sadd.s32 4294967294, %s3232_s27   ;;  %s3232_s27 = sphi %s3282_s27, %s4555_s27   ;;  %s3228_s26 = sphi %s3280_s26, %s4554_s26   ;;  %s3224_s25 = sphi %s3278_s25, %s4553_s25   ;;  %s3220_s24 = sphi %s3276_s24, %s4552_s24  }
   0x4   : > { %s3301_s30 = sadd.s32 1, %s3232_s27   ;;  %s179_s8 = sadd.s32 1, %s3228_s26 }
   0x5   : > { %s176_s9 = ssub.s32 %s3232_s27, %s3301_s30  ;;  %p189_p0 = scmp.ne.s32.totalorder %s3228_s26, %s3224_s25 }
   0x6   : > { %p177_p1 = scmp.eq.s32.totalorder %s176_s9, 0  ;;  %p190_p2 = scmp.eq.s32.totalorder %s3297_s28, 1 }
   0x7   : > { %p195_p3 = scmp.ne.s32.totalorder %s3224_s25, %s3220_s24  ;;  %p196_p4 = scmp.eq.s32.totalorder %s2472_s29, 1 }
   0x8   : > { %s3312_s10 = scalar_select %p177_p1, %s3228_s26, %s179_s8  }
   0x9   : > { %p3314_p5 = por %p190_p2, %p189_p0  ;;  %p3318_p6 = por %p196_p4, %p195_p3 }
   0xa   : > { %p2475_p7 = scmp.ge.s32.totalorder %s3232_s27, 1  ;;  %p242_p8 = scmp.lt.s32.totalorder %s3232_s27, 3 }
   0xc   : > { %p243_p9 = pnand %p2475_p7, %p242_p8 }
   0xd   : > { %s2477_s23 = sshll.u32 (!%p243_p9), %s3297_s28, 5  ;;  %s3128_s16 = sshll.u32 (!%p243_p9), %s3297_s28, 9 }
   0xe   : > { %246 = sbr.rel (%p243_p9) target bundleno = 956 (0x3bc), region = 48  ;;  %p276_p10 = scmp.lt.s32.totalorder (!%p243_p9), %s2477_s23, 63 }
   0xf   : > { %s2406_s19 = scalar_lea.hbm (!%p243_p9), %s4549_s7, %s3128_s16  ;;  %s3190_s13 = scalar_lea.hbm (!%p243_p9), %s4549_s7, 1024 }
  0x10   : > { %s2409_s21 = sshll.u32 (!%p243_p9), %s2406_s19, 4  ;;  %s2410_s21 = int_to_ptr.hbm [resolvable:$true] %s2409_s21 }
  0x11   : > { %s3184_s22 = sshra.s32 (!%p243_p9), %s2410_s21, 4  ;;  %s3185_s22 = int_to_ptr.hbm [resolvable:$true] %s3184_s22 }
  0x12   : > { %p3191_p0 = scmp.lt.s32.totalorder (!%p243_p9), %s3185_s22, %s4549_s7 }
  0x13   : > { %v2666_v0 = vld [vmem:[%s4543_s1 + $0x70] sm:$0xf]  ;;  %v3046_v1 = vld [vmem:[%s4543_s1 + $0x74] sm:$0xf0]  ;;  %v3045_v5 = vld [vmem:[%s4543_s1 + $0x74] sm:$0xf] }
  0x14   : > { %v2730_v2 = vld [vmem:[%s4543_s1 + $0xf0] sm:$0xf]  ;;  %v2667_v3 = vor.u32 %v3046_v1, %v2666_v0  ;;  %v3062_v4 = vld [vmem:[%s4543_s1 + $0xf4] sm:$0xf0]  ;;  %v2668_v6 = vld [vmem:[%s4543_s1 + $0x78] sm:$0xf0] }
  0x15   : > { %v2731_v7 = vor.u32 %v3062_v4, %v2730_v2  ;;  %v2671_v8 = vor.u32 %v3045_v5, %v2668_v6  ;;  %v3061_v9 = vld [vmem:[%s4543_s1 + $0xf4] sm:$0xf]  ;;  %v2732_v10 = vld [vmem:[%s4543_s1 + $0xf8] sm:$0xf0]  ;;  %v2658_v11 = vld [vmem:[%s4543_s1 + $0x60] sm:$0xf] }
  0x16   : > { %673 = vmatpush.bf16.msra.mxu0 %v2667_v3  ;;  %v2735_v12 = vor.u32 %v3061_v9, %v2732_v10  ;;  %v3044_v13 = vld [vmem:[%s4543_s1 + $0x64] sm:$0xf0]  ;;  %v2722_v14 = vld [vmem:[%s4543_s1 + $0xe0] sm:$0xf]  ;;  %v3043_v18 = vld [vmem:[%s4543_s1 + $0x64] sm:$0xf] }
  0x17   : > { %v3060_v15 = vld [vmem:[%s4543_s1 + $0xe4] sm:$0xf0]  ;;  %762 = vmatpush.bf16.msra.mxu1 %v2731_v7  ;;  %851 = vmatpush.bf16.msra.mxu2 %v2671_v8  ;;  %v2659_v16 = vor.u32 %v3044_v13, %v2658_v11  ;;  %v2660_v19 = vld [vmem:[%s4543_s1 + $0x68] sm:$0xf0]  ;;  %v3059_v20 = vld [vmem:[%s4543_s1 + $0xe4] sm:$0xf] }
  0x18   : > { %v2723_v17 = vor.u32 %v3060_v15, %v2722_v14  ;;  %940 = vmatpush.bf16.msra.mxu3 %v2735_v12  ;;  %v2663_v21 = vor.u32 %v3043_v18, %v2660_v19  ;;  %v2724_v22 = vld [vmem:[%s4543_s1 + $0xe8] sm:$0xf0]  ;;  %v2650_v23 = vld [vmem:[%s4543_s1 + $0x50] sm:$0xf]  ;;  %v3042_v24 = vld [vmem:[%s4543_s1 + $0x54] sm:$0xf0] }
  0x19   : > { %v2727_v25 = vor.u32 %v3059_v20, %v2724_v22  ;;  %v2714_v26 = vld [vmem:[%s4543_s1 + $0xd0] sm:$0xf]  ;;  %v3058_v27 = vld [vmem:[%s4543_s1 + $0xd4] sm:$0xf0]  ;;  %v3041_v28 = vld [vmem:[%s4543_s1 + $0x54] sm:$0xf]  ;;  %v2651_v29 = vor.u32 %v3042_v24, %v2650_v23 }
  0x1a   : > { %674 = vmatpush.bf16.msra.mxu0 %v2659_v16  ;;  %v2652_v30 = vld [vmem:[%s4543_s1 + $0x58] sm:$0xf0]  ;;  %v3057_v31 = vld [vmem:[%s4543_s1 + $0xd4] sm:$0xf]  ;;  %v2715_v33 = vor.u32 %v3058_v27, %v2714_v26  ;;  %v2642_v35 = vld [vmem:[%s4543_s1 + $0x40] sm:$0xf] }
  0x1b   : > { %v2716_v32 = vld [vmem:[%s4543_s1 + $0xd8] sm:$0xf0]  ;;  %763 = vmatpush.bf16.msra.mxu1 %v2723_v17  ;;  %852 = vmatpush.bf16.msra.mxu2 %v2663_v21  ;;  %v2655_v34 = vor.u32 %v3041_v28, %v2652_v30  ;;  %v3040_v36 = vld [vmem:[%s4543_s1 + $0x44] sm:$0xf0]  ;;  %v2706_v37 = vld [vmem:[%s4543_s1 + $0xc0] sm:$0xf] }
  0x1c   : > { %941 = vmatpush.bf16.msra.mxu3 %v2727_v25  ;;  %v2719_v38 = vor.u32 %v3057_v31, %v2716_v32  ;;  %v3056_v39 = vld [vmem:[%s4543_s1 + $0xc4] sm:$0xf0]  ;;  %v3039_v40 = vld [vmem:[%s4543_s1 + $0x44] sm:$0xf]  ;;  %v2644_v41 = vld [vmem:[%s4543_s1 + $0x48] sm:$0xf0]  ;;  %v2643_v44 = vor.u32 %v3040_v36, %v2642_v35 }
  0x1d   : > { %v3055_v42 = vld [vmem:[%s4543_s1 + $0xc4] sm:$0xf]  ;;  %v2708_v43 = vld [vmem:[%s4543_s1 + $0xc8] sm:$0xf0]  ;;  %v2707_v45 = vor.u32 %v3056_v39, %v2706_v37  ;;  %v2647_v46 = vor.u32 %v3039_v40, %v2644_v41  ;;  %v2634_v47 = vld [vmem:[%s4543_s1 + $0x30] sm:$0xf] }
  0x1e   : > { %675 = vmatpush.bf16.msra.mxu0 %v2651_v29  ;;  %v3038_v48 = vld [vmem:[%s4543_s1 + $0x34] sm:$0xf0]  ;;  %v2698_v49 = vld [vmem:[%s4543_s1 + $0xb0] sm:$0xf]  ;;  %v2711_v50 = vor.u32 %v3055_v42, %v2708_v43  ;;  %v3037_v52 = vld [vmem:[%s4543_s1 + $0x34] sm:$0xf] }
  0x1f   : > { %764 = vmatpush.bf16.msra.mxu1 %v2715_v33  ;;  %853 = vmatpush.bf16.msra.mxu2 %v2655_v34  ;;  %v3054_v51 = vld [vmem:[%s4543_s1 + $0xb4] sm:$0xf0]  ;;  %v2636_v53 = vld [vmem:[%s4543_s1 + $0x38] sm:$0xf0]  ;;  %v3053_v54 = vld [vmem:[%s4543_s1 + $0xb4] sm:$0xf]  ;;  %v2635_v56 = vor.u32 %v3038_v48, %v2634_v47 }
  0x20   : > { %942 = vmatpush.bf16.msra.mxu3 %v2719_v38  ;;  %v2700_v55 = vld [vmem:[%s4543_s1 + $0xb8] sm:$0xf0]  ;;  %v2699_v57 = vor.u32 %v3054_v51, %v2698_v49  ;;  %v2639_v58 = vor.u32 %v3037_v52, %v2636_v53  ;;  %v2626_v59 = vld [vmem:[%s4543_s1 + $0x20] sm:$0xf]  ;;  %v3036_v60 = vld [vmem:[%s4543_s1 + $0x24] sm:$0xf0] }
  0x21   : > { %v2690_v61 = vld [vmem:[%s4543_s1 + $0xa0] sm:$0xf]  ;;  %v2703_v62 = vor.u32 %v3053_v54, %v2700_v55  ;;  %v3052_v63 = vld [vmem:[%s4543_s1 + $0xa4] sm:$0xf0]  ;;  %v3035_v0 = vld [vmem:[%s4543_s1 + $0x24] sm:$0xf]  ;;  %v2627_v4 = vor.u32 %v3036_v60, %v2626_v59 }
  0x22   : > { %676 = vmatpush.bf16.msra.mxu0 %v2643_v44  ;;  %v2628_v1 = vld [vmem:[%s4543_s1 + $0x28] sm:$0xf0]  ;;  %v3051_v2 = vld [vmem:[%s4543_s1 + $0xa4] sm:$0xf]  ;;  %v2618_v5 = vld [vmem:[%s4543_s1 + $0x10] sm:$0xf]  ;;  %v2691_v6 = vor.u32 %v3052_v63, %v2690_v61 }
  0x23   : > { %765 = vmatpush.bf16.msra.mxu1 %v2707_v45  ;;  %854 = vmatpush.bf16.msra.mxu2 %v2647_v46  ;;  %v2692_v3 = vld [vmem:[%s4543_s1 + $0xa8] sm:$0xf0]  ;;  %v2631_v7 = vor.u32 %v3035_v0, %v2628_v1  ;;  %v3034_v8 = vld [vmem:[%s4543_s1 + $0x14] sm:$0xf0]  ;;  %v2682_v9 = vld [vmem:[%s4543_s1 + $0x90] sm:$0xf] }
  0x24   : > { %943 = vmatpush.bf16.msra.mxu3 %v2711_v50  ;;  %v3050_v10 = vld [vmem:[%s4543_s1 + $0x94] sm:$0xf0]  ;;  %v2695_v11 = vor.u32 %v3051_v2, %v2692_v3  ;;  %v3033_v12 = vld [vmem:[%s4543_s1 + $0x14] sm:$0xf]  ;;  %v2620_v13 = vld [vmem:[%s4543_s1 + $0x18] sm:$0xf0]  ;;  %v2619_v16 = vor.u32 %v3034_v8, %v2618_v5 }
  0x25   : > { %v3049_v14 = vld [vmem:[%s4543_s1 + $0x94] sm:$0xf]  ;;  %v2684_v15 = vld [vmem:[%s4543_s1 + $0x98] sm:$0xf0]  ;;  %v2610_v17 = vld [vmem:[%s4543_s1] sm:$0xf]  ;;  %v2683_v20 = vor.u32 %v3050_v10, %v2682_v9  ;;  %v2623_v21 = vor.u32 %v3033_v12, %v2620_v13 }
  0x26   : > { %677 = vmatpush.bf16.msra.mxu0 %v2635_v56  ;;  %v3032_v18 = vld [vmem:[%s4543_s1 + $0x4] sm:$0xf0]  ;;  %v2674_v19 = vld [vmem:[%s4543_s1 + $0x80] sm:$0xf]  ;;  %v3031_v23 = vld [vmem:[%s4543_s1 + $0x4] sm:$0xf]  ;;  %v2687_v24 = vor.u32 %v3049_v14, %v2684_v15 }
  0x27   : > { %766 = vmatpush.bf16.msra.mxu1 %v2699_v57  ;;  %855 = vmatpush.bf16.msra.mxu2 %v2639_v58  ;;  %v3048_v22 = vld [vmem:[%s4543_s1 + $0x84] sm:$0xf0]  ;;  %s4557_s23 = smov (!%p276_p10, %s2477_s23), 63  ;;  %v2612_v25 = vld [vmem:[%s4543_s1 + $0x8] sm:$0xf0]  ;;  %v2611_v30 = vor.u32 %v3032_v18, %v2610_v17 }
  0x28   : > { %944 = vmatpush.bf16.msra.mxu3 %v2703_v62  ;;  %v3047_v26 = vld [vmem:[%s4543_s1 + $0x84] sm:$0xf]  ;;  %v2676_v27 = vld [vmem:[%s4543_s1 + $0x88] sm:$0xf0]  ;;  %s2998_s17 = sshll.u32 %s4557_s23, 3  ;;  %v2675_v33 = vor.u32 %v3048_v22, %v2674_v19  ;;  %v2615_v34 = vor.u32 %v3031_v23, %v2612_v25  ;;  %s272_s23 = sand.u32 1, %s3224_s25  }
  0x29   : > { %v3077_v28 = vld [vmem:[%s4545_s3 + $0x74] sm:$0xf]  ;;  %v2796_v29 = vld [vmem:[%s4545_s3 + $0x78] sm:$0xf0]  ;;  %s3526_s8 = scalar_lea.vmem %s4542_s0, %s2998_s17  ;;  %v2679_v38 = vor.u32 %v3047_v26, %v2676_v27  ;;  %v2794_v41 = vld [vmem:[%s4545_s3 + $0x70] sm:$0xf] }
  0x2a   : > { %678 = vmatpush.bf16.msra.mxu0 %v2627_v4  ;;  %v3093_v31 = vld [vmem:[%s4545_s3 + $0xf4] sm:$0xf]  ;;  %v2860_v32 = vld [vmem:[%s4545_s3 + $0xf8] sm:$0xf0]  ;;  %v2482_v35 = vld [vmem:[%s3526_s8] sm:$0xf]  ;;  %v2799_v40 = vor.u32 %v3077_v28, %v2796_v29 }
  0x2b   : > { %767 = vmatpush.bf16.msra.mxu1 %v2691_v6  ;;  %856 = vmatpush.bf16.msra.mxu2 %v2631_v7  ;;  %v3000_v36 = vld [vmem:[%s3526_s8 + $0x4] sm:$0xf0]  ;;  %v2999_v37 = vld [vmem:[%s3526_s8 + $0x4] sm:$0xf]  ;;  %v2484_v39 = vld [vmem:[%s3526_s8 + $0x8] sm:$0xf0]  ;;  %v2863_v44 = vor.u32 %v3093_v31, %v2860_v32 }
  0x2c   : > { %945 = vmatpush.bf16.msra.mxu3 %v2695_v11  ;;  %v3078_v42 = vld [vmem:[%s4545_s3 + $0x74] sm:$0xf0]  ;;  %v2483_v43 = vor.u32 %v3000_v36, %v2482_v35  ;;  %v2858_v45 = vld [vmem:[%s4545_s3 + $0xf0] sm:$0xf]  ;;  %v2487_v47 = vor.u32 %v2999_v37, %v2484_v39  ;;  %v3075_v50 = vld [vmem:[%s4545_s3 + $0x64] sm:$0xf] }
  0x2d   : > { %v3094_v46 = vld [vmem:[%s4545_s3 + $0xf4] sm:$0xf0]  ;;  %v2795_v48 = vor.u32 %v3078_v42, %v2794_v41  ;;  %v2788_v51 = vld [vmem:[%s4545_s3 + $0x68] sm:$0xf0]  ;;  %v3091_v52 = vld [vmem:[%s4545_s3 + $0xe4] sm:$0xf] }
  0x2e   : > { %679 = vmatpush.bf16.msra.mxu0 %v2619_v16  ;;  %v2859_v49 = vor.u32 %v3094_v46, %v2858_v45  ;;  %v2791_v53 = vor.u32 %v3075_v50, %v2788_v51  ;;  %v2852_v54 = vld [vmem:[%s4545_s3 + $0xe8] sm:$0xf0]  ;;  %v2786_v55 = vld [vmem:[%s4545_s3 + $0x60] sm:$0xf]  ;;  %v3076_v56 = vld [vmem:[%s4545_s3 + $0x64] sm:$0xf0] }
  0x2f   : > { %768 = vmatpush.bf16.msra.mxu1 %v2683_v20  ;;  %857 = vmatpush.bf16.msra.mxu2 %v2623_v21  ;;  %v2855_v57 = vor.u32 %v3091_v52, %v2852_v54  ;;  %v2787_v58 = vor.u32 %v3076_v56, %v2786_v55  ;;  %v2850_v59 = vld [vmem:[%s4545_s3 + $0xe0] sm:$0xf]  ;;  %v3092_v60 = vld [vmem:[%s4545_s3 + $0xe4] sm:$0xf0]  ;;  %v2490_v62 = vld [vmem:[%s3526_s8 + $0x10] sm:$0xf] }
  0x30   : > { %946 = vmatpush.bf16.msra.mxu3 %v2687_v24  ;;  %v2851_v61 = vor.u32 %v3092_v60, %v2850_v59  ;;  %v3002_v63 = vld [vmem:[%s3526_s8 + $0x14] sm:$0xf0]  ;;  %v3001_v0 = vld [vmem:[%s3526_s8 + $0x14] sm:$0xf]  ;;  %v2492_v1 = vld [vmem:[%s3526_s8 + $0x18] sm:$0xf0] }
  0x31   : > { %v2491_v2 = vor.u32 %v3002_v63, %v2490_v62  ;;  %v2495_v3 = vor.u32 %v3001_v0, %v2492_v1  ;;  %v2498_v4 = vld [vmem:[%s3526_s8 + $0x20] sm:$0xf]  ;;  %v3004_v5 = vld [vmem:[%s3526_s8 + $0x24] sm:$0xf0]  ;;  %v3003_v6 = vld [vmem:[%s3526_s8 + $0x24] sm:$0xf] }
  0x32   : > { %680 = vmatpush.bf16.msra.mxu0 %v2611_v30  ;;  %v2500_v7 = vld [vmem:[%s3526_s8 + $0x28] sm:$0xf0]  ;;  %v2499_v8 = vor.u32 %v3004_v5, %v2498_v4  ;;  %v3073_v10 = vld [vmem:[%s4545_s3 + $0x54] sm:$0xf]  ;;  %v2780_v11 = vld [vmem:[%s4545_s3 + $0x58] sm:$0xf0] }
  0x33   : > { %769 = vmatpush.bf16.msra.mxu1 %v2675_v33  ;;  %858 = vmatpush.bf16.msra.mxu2 %v2615_v34  ;;  %v2503_v9 = vor.u32 %v3003_v6, %v2500_v7  ;;  %v3089_v12 = vld [vmem:[%s4545_s3 + $0xd4] sm:$0xf]  ;;  %v2783_v13 = vor.u32 %v3073_v10, %v2780_v11  ;;  %v2844_v14 = vld [vmem:[%s4545_s3 + $0xd8] sm:$0xf0]  ;;  %v2778_v15 = vld [vmem:[%s4545_s3 + $0x50] sm:$0xf] }
  0x34   : > { %947 = vmatpush.bf16.msra.mxu3 %v2679_v38  ;;  %v3074_v16 = vld [vmem:[%s4545_s3 + $0x54] sm:$0xf0]  ;;  %v2847_v17 = vor.u32 %v3089_v12, %v2844_v14  ;;  %v2842_v19 = vld [vmem:[%s4545_s3 + $0xd0] sm:$0xf]  ;;  %v3005_v24 = vld [vmem:[%s3526_s8 + $0x34] sm:$0xf] }
  0x35   : > { %681 = vmatmul.bf16.vlgmr.msra.gmra.mxu0 %v2483_v43  ;;  %v2779_v18 = vor.u32 %v3074_v16, %v2778_v15  ;;  %v3090_v20 = vld [vmem:[%s4545_s3 + $0xd4] sm:$0xf0]  ;;  %v2506_v22 = vld [vmem:[%s3526_s8 + $0x30] sm:$0xf]  ;;  %v2508_v25 = vld [vmem:[%s3526_s8 + $0x38] sm:$0xf0] }
  0x36   : > { %770 = vmatmul.bf16.vlgmr.msra.gmra.mxu1 %v2487_v47  ;;  %859 = vmatmul.bf16.vlgmr.msra.gmra.mxu2 %v2483_v43  ;;  %v2843_v21 = vor.u32 %v3090_v20, %v2842_v19  ;;  %v3006_v23 = vld [vmem:[%s3526_s8 + $0x34] sm:$0xf0]  ;;  %v2511_v27 = vor.u32 %v3005_v24, %v2508_v25  ;;  %v2514_v28 = vld [vmem:[%s3526_s8 + $0x40] sm:$0xf]  ;;  %v3008_v29 = vld [vmem:[%s3526_s8 + $0x44] sm:$0xf0] }
  0x37   : > { %1501 = vmatpush.bf16.msrb.mxu2 %v2799_v40  ;;  %948 = vmatmul.bf16.vlgmr.msra.gmra.mxu3 %v2487_v47  ;;  %v2507_v26 = vor.u32 %v3006_v23, %v2506_v22  ;;  %v3007_v30 = vld [vmem:[%s3526_s8 + $0x44] sm:$0xf]  ;;  %v2516_v31 = vld [vmem:[%s3526_s8 + $0x48] sm:$0xf0]  ;;  %v2515_v32 = vor.u32 %v3008_v29, %v2514_v28  ;;  %v2770_v39 = vld [vmem:[%s4545_s3 + $0x40] sm:$0xf] }
  0x38   : > { %1590 = vmatpush.bf16.msrb.mxu3 %v2863_v44  ;;  %1323 = vmatpush.bf16.msrb.mxu0 %v2795_v48  ;;  %v2519_v33 = vor.u32 %v3007_v30, %v2516_v31  ;;  %v3071_v34 = vld [vmem:[%s4545_s3 + $0x44] sm:$0xf]  ;;  %v2772_v35 = vld [vmem:[%s4545_s3 + $0x48] sm:$0xf0]  ;;  %v3072_v40 = vld [vmem:[%s4545_s3 + $0x44] sm:$0xf0] }
  0x39   : > { %1412 = vmatpush.bf16.msrb.mxu1 %v2859_v49  ;;  %v3087_v36 = vld [vmem:[%s4545_s3 + $0xc4] sm:$0xf]  ;;  %v2775_v37 = vor.u32 %v3071_v34, %v2772_v35  ;;  %v2836_v38 = vld [vmem:[%s4545_s3 + $0xc8] sm:$0xf0]  ;;  %v2771_v42 = vor.u32 %v3072_v40, %v2770_v39  ;;  %v2834_v43 = vld [vmem:[%s4545_s3 + $0xc0] sm:$0xf] }
  0x3a   : > { %v2839_v41 = vor.u32 %v3087_v36, %v2836_v38  ;;  %v3088_v44 = vld [vmem:[%s4545_s3 + $0xc4] sm:$0xf0]  ;;  %v2522_v46 = vld [vmem:[%s3526_s8 + $0x50] sm:$0xf]  ;;  %v3010_v47 = vld [vmem:[%s3526_s8 + $0x54] sm:$0xf0] }
  0x3b   : > { %1502 = vmatpush.bf16.msrb.mxu2 %v2791_v53  ;;  %v2835_v45 = vor.u32 %v3088_v44, %v2834_v43  ;;  %v3009_v48 = vld [vmem:[%s3526_s8 + $0x54] sm:$0xf]  ;;  %v2524_v49 = vld [vmem:[%s3526_s8 + $0x58] sm:$0xf0]  ;;  %v2523_v50 = vor.u32 %v3010_v47, %v2522_v46  ;;  %v2530_v52 = vld [vmem:[%s3526_s8 + $0x60] sm:$0xf] }
  0x3c   : > { %1591 = vmatpush.bf16.msrb.mxu3 %v2855_v57  ;;  %1324 = vmatpush.bf16.msrb.mxu0 %v2787_v58  ;;  %v2527_v51 = vor.u32 %v3009_v48, %v2524_v49  ;;  %v3012_v53 = vld [vmem:[%s3526_s8 + $0x64] sm:$0xf0]  ;;  %v3011_v54 = vld [vmem:[%s3526_s8 + $0x64] sm:$0xf]  ;;  %v2532_v55 = vld [vmem:[%s3526_s8 + $0x68] sm:$0xf0] }
  0x3d   : > { %1413 = vmatpush.bf16.msrb.mxu1 %v2851_v61  ;;  %v2531_v56 = vor.u32 %v3012_v53, %v2530_v52  ;;  %v2535_v57 = vor.u32 %v3011_v54, %v2532_v55  ;;  %v3069_v58 = vld [vmem:[%s4545_s3 + $0x34] sm:$0xf]  ;;  %v2764_v59 = vld [vmem:[%s4545_s3 + $0x38] sm:$0xf0]  ;;  %v2538_v0 = vld [vmem:[%s3526_s8 + $0x70] sm:$0xf] }
  0x3e   : > { %v3085_v60 = vld [vmem:[%s4545_s3 + $0xb4] sm:$0xf]  ;;  %v2767_v61 = vor.u32 %v3069_v58, %v2764_v59  ;;  %v2828_v62 = vld [vmem:[%s4545_s3 + $0xb8] sm:$0xf0]  ;;  %v3014_v1 = vld [vmem:[%s3526_s8 + $0x74] sm:$0xf0] }
  0x3f   : > { %1503 = vmatpush.bf16.msrb.mxu2 %v2783_v13  ;;  %v2831_v63 = vor.u32 %v3085_v60, %v2828_v62  ;;  %v2539_v4 = vor.u32 %v3014_v1, %v2538_v0  ;;  %v2762_v5 = vld [vmem:[%s4545_s3 + $0x30] sm:$0xf]  ;;  %v3070_v6 = vld [vmem:[%s4545_s3 + $0x34] sm:$0xf0]  ;;  %v347_v12 = vld [vmem:[%s4544_s2] sm:$0x3] }
  0x40   : > { %1592 = vmatpush.bf16.msrb.mxu3 %v2847_v17  ;;  %1325 = vmatpush.bf16.msrb.mxu0 %v2779_v18  ;;  %v2826_v7 = vld [vmem:[%s4545_s3 + $0xb0] sm:$0xf]  ;;  %v3086_v10 = vld [vmem:[%s4545_s3 + $0xb4] sm:$0xf0]  ;;  %v2546_v13 = vld [vmem:[%s3526_s8 + $0x80] sm:$0xf] }
  0x41   : > { %1414 = vmatpush.bf16.msrb.mxu1 %v2843_v21  ;;  %v2827_v11 = vor.u32 %v3086_v10, %v2826_v7  ;;  %v3016_v14 = vld [vmem:[%s3526_s8 + $0x84] sm:$0xf0]  ;;  %v3679_v15 = vperm.slane %v347_v12, 0  ;;  %v3015_v16 = vld [vmem:[%s3526_s8 + $0x84] sm:$0xf]  ;;  %v3684_v24 = vperm.slane %v347_v12, 1 }
  0x42   : > { %v2548_v17 = vld [vmem:[%s3526_s8 + $0x88] sm:$0xf0]  ;;  %v2547_v18 = vor.u32 %v3016_v14, %v2546_v13  ;;  %v3067_v25 = vld [vmem:[%s4545_s3 + $0x24] sm:$0xf]  ;;  %v2554_v39 = vld [vmem:[%s3526_s8 + $0x90] sm:$0xf] }
  0x43   : > { %1504 = vmatpush.bf16.msrb.mxu2 %v2775_v37  ;;  %v2551_v20 = vor.u32 %v3015_v16, %v2548_v17  ;;  %v3083_v28 = vld [vmem:[%s4545_s3 + $0xa4] sm:$0xf]  ;;  %v2820_v29 = vld [vmem:[%s4545_s3 + $0xa8] sm:$0xf0]  ;;  %v3018_v40 = vld [vmem:[%s3526_s8 + $0x94] sm:$0xf0] }
  0x44   : > { %1593 = vmatpush.bf16.msrb.mxu3 %v2839_v41  ;;  %1326 = vmatpush.bf16.msrb.mxu0 %v2771_v42  ;;  %v2823_v31 = vor.u32 %v3083_v28, %v2820_v29  ;;  %v3017_v41 = vld [vmem:[%s3526_s8 + $0x94] sm:$0xf]  ;;  %v2556_v42 = vld [vmem:[%s3526_s8 + $0x98] sm:$0xf0]  ;;  %v3068_v46 = vld [vmem:[%s4545_s3 + $0x24] sm:$0xf0]  ;;  %v2555_v52 = vor.u32 %v3018_v40, %v2554_v39 }
  0x45   : > { %686 = vmatmul.bf16.gmra.mxu0 %v2491_v2  ;;  %1415 = vmatpush.bf16.msrb.mxu1 %v2835_v45  ;;  %v2754_v45 = vld [vmem:[%s4545_s3 + $0x20] sm:$0xf]  ;;  %v3084_v49 = vld [vmem:[%s4545_s3 + $0xa4] sm:$0xf0]  ;;  %v3019_v13 = vld [vmem:[%s3526_s8 + $0xa4] sm:$0xf] }
  0x46   : > { %775 = vmatmul.bf16.gmra.mxu1 %v2495_v3  ;;  %864 = vmatmul.bf16.gmra.mxu2 %v2491_v2  ;;  %v3013_v2 = vld [vmem:[%s3526_s8 + $0x74] sm:$0xf]  ;;  %v2755_v47 = vor.u32 %v3068_v46, %v2754_v45  ;;  %v2818_v48 = vld [vmem:[%s4545_s3 + $0xa0] sm:$0xf]  ;;  %v3020_v10 = vld [vmem:[%s3526_s8 + $0xa4] sm:$0xf0] }
  0x47   : > { %953 = vmatmul.bf16.gmra.mxu3 %v2495_v3  ;;  %1505 = vmatpush.bf16.msrb.mxu2 %v2767_v61  ;;  %v2540_v3 = vld [vmem:[%s3526_s8 + $0x78] sm:$0xf0]  ;;  %v2819_v53 = vor.u32 %v3084_v49, %v2818_v48  ;;  %v2564_v14 = vld [vmem:[%s3526_s8 + $0xa8] sm:$0xf0]  ;;  %v2570_v45 = vld [vmem:[%s3526_s8 + $0xb0] sm:$0xf] }
  0x48   : > { %1594 = vmatpush.bf16.msrb.mxu3 %v2831_v63  ;;  %v3022_v46 = vld [vmem:[%s3526_s8 + $0xb4] sm:$0xf0]  ;;  %v2572_v48 = vld [vmem:[%s3526_s8 + $0xb8] sm:$0xf0]  ;;  %s2476_s14 = sshll.u32 %s272_s23, 9  ;;  %s2394_s28 = scalar_lea.sflag [#allocation3], %s272_s23 }
  0x49   : > { %1416 = vmatpush.bf16.msrb.mxu1 %v2827_v11  ;;  %s4351_s15 = scalar_lea.vmem [#allocation2], %s2476_s14 }
  0x4a   : > { %s2407_s20 = sshll.u32 %s4351_s15, 4  ;;  %s2408_s20 = int_to_ptr.vmem [resolvable:$true] %s2407_s20 }
  0x4c   : > { %1595 = vmatpush.bf16.msrb.mxu3 %v2823_v31  ;;  %v2748_v31 = vld [vmem:[%s4545_s3 + $0x18] sm:$0xf0] }
  0x4d   : > { %1417 = vmatpush.bf16.msrb.mxu1 %v2819_v53  ;;  %v3066_v53 = vld [vmem:[%s4545_s3 + $0x14] sm:$0xf0] }
  0x55   : > { %691 = vmatmul.bf16.gmra.mxu0 %v2499_v8 }
  0x56   : > { %780 = vmatmul.bf16.gmra.mxu1 %v2503_v9  ;;  %869 = vmatmul.bf16.gmra.mxu2 %v2499_v8  ;;  %v2543_v8 = vor.u32 %v3013_v2, %v2540_v3 }
  0x57   : > { %958 = vmatmul.bf16.gmra.mxu3 %v2503_v9  ;;  %v2763_v9 = vor.u32 %v3070_v6, %v2762_v5 }
  0x59   : > { %1327 = vmatpush.bf16.msrb.mxu0 %v2763_v9  ;;  %v2562_v9 = vld [vmem:[%s3526_s8 + $0xa0] sm:$0xf] }
  0x5a   : > { %v2563_v17 = vor.u32 %v3020_v10, %v2562_v9 }
  0x5d   : > { %1328 = vmatpush.bf16.msrb.mxu0 %v2755_v47  ;;  %v3021_v47 = vld [vmem:[%s3526_s8 + $0xb4] sm:$0xf] }
  0x65   : > { %696 = vmatmul.bf16.gmra.mxu0 %v2507_v26 }
  0x66   : > { %785 = vmatmul.bf16.gmra.mxu1 %v2511_v27  ;;  %874 = vmatmul.bf16.gmra.mxu2 %v2507_v26  ;;  %v2756_v26 = vld [vmem:[%s4545_s3 + $0x28] sm:$0xf0] }
  0x67   : > { %963 = vmatmul.bf16.gmra.mxu3 %v2511_v27  ;;  %v2759_v27 = vor.u32 %v3067_v25, %v2756_v26 }
  0x69   : > { %1506 = vmatpush.bf16.msrb.mxu2 %v2759_v27 }
  0x75   : > { %701 = vmatmul.bf16.gmra.mxu0 %v2515_v32 }
  0x76   : > { %790 = vmatmul.bf16.gmra.mxu1 %v2519_v33  ;;  %879 = vmatmul.bf16.gmra.mxu2 %v2515_v32 }
  0x77   : > { %968 = vmatmul.bf16.gmra.mxu3 %v2519_v33 }
  0x85   : > { %706 = vmatmul.bf16.gmra.mxu0 %v2523_v50 }
  0x86   : > { %795 = vmatmul.bf16.gmra.mxu1 %v2527_v51  ;;  %884 = vmatmul.bf16.gmra.mxu2 %v2523_v50 }
  0x87   : > { %973 = vmatmul.bf16.gmra.mxu3 %v2527_v51 }
  0x95   : > { %711 = vmatmul.bf16.gmra.mxu0 %v2531_v56 }
  0x96   : > { %800 = vmatmul.bf16.gmra.mxu1 %v2535_v57  ;;  %889 = vmatmul.bf16.gmra.mxu2 %v2531_v56 }
  0x97   : > { %978 = vmatmul.bf16.gmra.mxu3 %v2535_v57  ;;  %v2559_v57 = vor.u32 %v3017_v41, %v2556_v42 }
  0xa5   : > { %716 = vmatmul.bf16.gmra.mxu0 %v2539_v4 }
  0xa6   : > { %805 = vmatmul.bf16.gmra.mxu1 %v2543_v8  ;;  %894 = vmatmul.bf16.gmra.mxu2 %v2539_v4 }
  0xa7   : > { %983 = vmatmul.bf16.gmra.mxu3 %v2543_v8 }
  0xb2   : > { %v682_v19 = vpop.f32.mrf.mxu0 }
  0xb3   : > { %v683_v21 = vadd.f32 %v682_v19, %v3679_v15  ;;  %v771_v22 = vpop.f32.mrf.mxu1 }
  0xb5   : > { %v772_v23 = vadd.f32 %v771_v22, %v683_v21  ;;  %721 = vmatmul.bf16.gmra.mxu0 %v2547_v18  ;;  %v2567_v22 = vor.u32 %v3019_v13, %v2564_v14 }
  0xb6   : > { %810 = vmatmul.bf16.gmra.mxu1 %v2551_v20  ;;  %899 = vmatmul.bf16.gmra.mxu2 %v2547_v18 }
  0xb7   : > { %988 = vmatmul.bf16.gmra.mxu3 %v2551_v20  ;;  %v1029_v43 = vmax.f32 %v772_v23, 0.0 }
  0xb9   : > { %v860_v30 = vpop.f32.mrf.mxu2 }
  0xba   : > { %v861_v32 = vadd.f32 %v860_v30, %v3684_v24  ;;  %v949_v33 = vpop.f32.mrf.mxu3  ;;  %v684_v34 = vpop.f32.mrf.mxu0  ;;  %v3065_v30 = vld [vmem:[%s4545_s3 + $0x14] sm:$0xf] }
  0xbb   : > { %v685_v35 = vadd.f32 %v684_v34, %v3679_v15  ;;  %v773_v36 = vpop.f32.mrf.mxu1  ;;  %v2812_v34 = vld [vmem:[%s4545_s3 + $0x98] sm:$0xf0] }
  0xbc   : > { %v950_v37 = vadd.f32 %v949_v33, %v861_v32  ;;  %v2751_v32 = vor.u32 %v3065_v30, %v2748_v31  ;;  %v3081_v33 = vld [vmem:[%s4545_s3 + $0x94] sm:$0xf] }
  0xbd   : > { %v774_v38 = vadd.f32 %v773_v36, %v685_v35 }
  0xbe   : > { %v1030_v62 = vmax.f32 %v950_v37, 0.0  ;;  %v2815_v37 = vor.u32 %v3081_v33, %v2812_v34  ;;  %1507 = vmatpush.bf16.msrb.mxu2 %v2751_v32 }
  0xbf   : > { %v1031_v44 = vmax.f32 %v774_v38, 0.0 }
  0xc0   : > { %1596 = vmatpush.bf16.msrb.mxu3 %v2815_v37 }
  0xc1   : > { %v3716_v50 = vpack.c.bf16 %v1031_v44, %v1029_v43  ;;  %v862_v51 = vpop.f32.mrf.mxu2 }
  0xc2   : > { %v863_v54 = vadd.f32 %v862_v51, %v3684_v24  ;;  %v951_v55 = vpop.f32.mrf.mxu3  ;;  %v687_v56 = vpop.f32.mrf.mxu0 }
  0xc3   : > { %v688_v58 = vadd.f32 %v687_v56, %v3679_v15  ;;  %v776_v59 = vpop.f32.mrf.mxu1  ;;  %v3082_v56 = vld [vmem:[%s4545_s3 + $0x94] sm:$0xf0] }
  0xc4   : > { %v952_v60 = vadd.f32 %v951_v55, %v863_v54  ;;  %v2810_v55 = vld [vmem:[%s4545_s3 + $0x90] sm:$0xf] }
  0xc5   : > { %v777_v61 = vadd.f32 %v776_v59, %v688_v58  ;;  %726 = vmatmul.bf16.gmra.mxu0 %v2555_v52  ;;  %v2571_v58 = vor.u32 %v3022_v46, %v2570_v45  ;;  %v2811_v59 = vor.u32 %v3082_v56, %v2810_v55  ;;  %v2586_v56 = vld [vmem:[%s3526_s8 + $0xd0] sm:$0xf] }
  0xc6   : > { %v1032_v63 = vmax.f32 %v952_v60, 0.0  ;;  %815 = vmatmul.bf16.gmra.mxu1 %v2559_v57  ;;  %904 = vmatmul.bf16.gmra.mxu2 %v2555_v52  ;;  %v2746_v52 = vld [vmem:[%s4545_s3 + $0x10] sm:$0xf] }
  0xc7   : > { %993 = vmatmul.bf16.gmra.mxu3 %v2559_v57  ;;  %v1033_v11 = vmax.f32 %v777_v61, 0.0  ;;  %v2747_v54 = vor.u32 %v3066_v53, %v2746_v52  ;;  %1418 = vmatpush.bf16.msrb.mxu1 %v2811_v59  ;;  %v2588_v59 = vld [vmem:[%s3526_s8 + $0xd8] sm:$0xf0] }
  0xc8   : > { %v3720_v0 = vpack.c.bf16 %v1032_v63, %v1030_v62 }
  0xc9   : > { %v865_v1 = vpop.f32.mrf.mxu2  ;;  %1329 = vmatpush.bf16.msrb.mxu0 %v2747_v54 }
  0xca   : > { %v866_v2 = vadd.f32 %v865_v1, %v3684_v24  ;;  %v954_v3 = vpop.f32.mrf.mxu3  ;;  %v689_v4 = vpop.f32.mrf.mxu0  ;;  %v2575_v1 = vor.u32 %v3021_v47, %v2572_v48 }
  0xcb   : > { %v690_v5 = vadd.f32 %v689_v4, %v3679_v15  ;;  %v778_v6 = vpop.f32.mrf.mxu1 }
  0xcc   : > { %v955_v7 = vadd.f32 %v954_v3, %v866_v2 }
  0xcd   : > { %v779_v8 = vadd.f32 %v778_v6, %v690_v5 }
  0xce   : > { %v1034_v28 = vmax.f32 %v955_v7, 0.0 }
  0xcf   : > { %v1035_v12 = vmax.f32 %v779_v8, 0.0 }
  0xd1   : > { %v867_v16 = vpop.f32.mrf.mxu2  ;;  %v3728_v18 = vpack.c.bf16 %v1035_v12, %v1033_v11 }
  0xd2   : > { %v868_v19 = vadd.f32 %v867_v16, %v3684_v24  ;;  %v956_v20 = vpop.f32.mrf.mxu3  ;;  %v692_v21 = vpop.f32.mrf.mxu0 }
  0xd3   : > { %v693_v23 = vadd.f32 %v692_v21, %v3679_v15  ;;  %v781_v25 = vpop.f32.mrf.mxu1 }
  0xd4   : > { %v957_v26 = vadd.f32 %v956_v20, %v868_v19  ;;  %v2578_v19 = vld [vmem:[%s3526_s8 + $0xc0] sm:$0xf]  ;;  %v3024_v20 = vld [vmem:[%s3526_s8 + $0xc4] sm:$0xf0] }
  0xd5   : > { %v782_v27 = vadd.f32 %v781_v25, %v693_v23  ;;  %731 = vmatmul.bf16.gmra.mxu0 %v2563_v17  ;;  %v3023_v23 = vld [vmem:[%s3526_s8 + $0xc4] sm:$0xf]  ;;  %v2580_v25 = vld [vmem:[%s3526_s8 + $0xc8] sm:$0xf0] }
  0xd6   : > { %v1036_v29 = vmax.f32 %v957_v26, 0.0  ;;  %820 = vmatmul.bf16.gmra.mxu1 %v2567_v22  ;;  %909 = vmatmul.bf16.gmra.mxu2 %v2563_v17  ;;  %v2583_v32 = vor.u32 %v3023_v23, %v2580_v25 }
  0xd7   : > { %998 = vmatmul.bf16.gmra.mxu3 %v2567_v22  ;;  %v1037_v49 = vmax.f32 %v782_v27, 0.0  ;;  %v2579_v27 = vor.u32 %v3024_v20, %v2578_v19 }
  0xd8   : > { %v3744_v35 = vpack.c.bf16 %v1036_v29, %v1034_v28 }
  0xd9   : > { %v870_v36 = vpop.f32.mrf.mxu2 }
  0xda   : > { %v871_v38 = vadd.f32 %v870_v36, %v3684_v24  ;;  %v959_v39 = vpop.f32.mrf.mxu3  ;;  %v694_v40 = vpop.f32.mrf.mxu0 }
  0xdb   : > { %v695_v41 = vadd.f32 %v694_v40, %v3679_v15  ;;  %v783_v42 = vpop.f32.mrf.mxu1  ;;  %v3063_v40 = vld [vmem:[%s4545_s3 + $0x4] sm:$0xf] }
  0xdc   : > { %v960_v43 = vadd.f32 %v959_v39, %v871_v38 }
  0xdd   : > { %v784_v44 = vadd.f32 %v783_v42, %v695_v41  ;;  %v2740_v41 = vld [vmem:[%s4545_s3 + $0x8] sm:$0xf0] }
  0xde   : > { %v1038_v6 = vmax.f32 %v960_v43, 0.0  ;;  %v2743_v42 = vor.u32 %v3063_v40, %v2740_v41  ;;  %v3079_v43 = vld [vmem:[%s4545_s3 + $0x84] sm:$0xf] }
  0xdf   : > { %v1039_v51 = vmax.f32 %v784_v44, 0.0  ;;  %v2804_v44 = vld [vmem:[%s4545_s3 + $0x88] sm:$0xf0] }
  0xe0   : > { %v2807_v47 = vor.u32 %v3079_v43, %v2804_v44  ;;  %1508 = vmatpush.bf16.msrb.mxu2 %v2743_v42 }
  0xe1   : > { %v872_v57 = vpop.f32.mrf.mxu2  ;;  %v3764_v60 = vpack.c.bf16 %v1039_v51, %v1037_v49 }
  0xe2   : > { %v873_v61 = vadd.f32 %v872_v57, %v3684_v24  ;;  %v961_v62 = vpop.f32.mrf.mxu3  ;;  %v697_v63 = vpop.f32.mrf.mxu0  ;;  %1597 = vmatpush.bf16.msrb.mxu3 %v2807_v47  ;;  %v3026_v57 = vld [vmem:[%s3526_s8 + $0xd4] sm:$0xf0] }
  0xe3   : > { %v698_v2 = vadd.f32 %v697_v63, %v3679_v15  ;;  %v786_v3 = vpop.f32.mrf.mxu1  ;;  %v2738_v63 = vld [vmem:[%s4545_s3] sm:$0xf] }
  0xe4   : > { %v962_v4 = vadd.f32 %v961_v62, %v873_v61 }
  0xe5   : > { %v787_v5 = vadd.f32 %v786_v3, %v698_v2  ;;  %736 = vmatmul.bf16.gmra.mxu0 %v2571_v58  ;;  %v2802_v3 = vld [vmem:[%s4545_s3 + $0x80] sm:$0xf] }
  0xe6   : > { %v1040_v7 = vmax.f32 %v962_v4, 0.0  ;;  %825 = vmatmul.bf16.gmra.mxu1 %v2575_v1  ;;  %914 = vmatmul.bf16.gmra.mxu2 %v2571_v58  ;;  %v3025_v58 = vld [vmem:[%s3526_s8 + $0xd4] sm:$0xf]  ;;  %v3080_v4 = vld [vmem:[%s4545_s3 + $0x84] sm:$0xf0] }
  0xe7   : > { %1003 = vmatmul.bf16.gmra.mxu3 %v2575_v1  ;;  %v1041_v21 = vmax.f32 %v787_v5, 0.0  ;;  %v3064_v1 = vld [vmem:[%s4545_s3 + $0x4] sm:$0xf0] }
  0xe8   : > { %v3768_v8 = vpack.c.bf16 %v1040_v7, %v1038_v6  ;;  %v2739_v2 = vor.u32 %v3064_v1, %v2738_v63  ;;  %v2587_v6 = vor.u32 %v3026_v57, %v2586_v56  ;;  %v2803_v7 = vor.u32 %v3080_v4, %v2802_v3  ;;  %v2924_v56 = vld [vmem:[%s4547_s5 + $0x78] sm:$0xf0] }
  0xe9   : > { %v875_v9 = vpop.f32.mrf.mxu2 }
  0xea   : > { %v876_v10 = vadd.f32 %v875_v9, %v3684_v24  ;;  %v964_v11 = vpop.f32.mrf.mxu3  ;;  %v699_v12 = vpop.f32.mrf.mxu0  ;;  %1330 = vmatpush.bf16.msrb.mxu0 %v2739_v2  ;;  %1419 = vmatpush.bf16.msrb.mxu1 %v2803_v7 }
  0xeb   : > { %v700_v13 = vadd.f32 %v699_v12, %v3679_v15  ;;  %v788_v14 = vpop.f32.mrf.mxu1 }
  0xec   : > { %v965_v16 = vadd.f32 %v964_v11, %v876_v10 }
  0xed   : > { %v789_v17 = vadd.f32 %v788_v14, %v700_v13  ;;  %v2591_v13 = vor.u32 %v3025_v58, %v2588_v59  ;;  %v3125_v58 = vld [vmem:[%s4547_s5 + $0xf4] sm:$0xf]  ;;  %v2988_v59 = vld [vmem:[%s4547_s5 + $0xf8] sm:$0xf0] }
  0xee   : > { %v1042_v38 = vmax.f32 %v965_v16, 0.0  ;;  %v2991_v63 = vor.u32 %v3125_v58, %v2988_v59 }
  0xef   : > { %v1043_v22 = vmax.f32 %v789_v17, 0.0 }
  0xf0   : > { %2176 = vmatpush.bf16.msra.mxu3 %v2991_v63 }
  0xf1   : > { %v877_v26 = vpop.f32.mrf.mxu2  ;;  %v3776_v28 = vpack.c.bf16 %v1043_v22, %v1041_v21 }
  0xf2   : > { %v878_v29 = vadd.f32 %v877_v26, %v3684_v24  ;;  %v966_v30 = vpop.f32.mrf.mxu3  ;;  %v702_v31 = vpop.f32.mrf.mxu0 }
  0xf3   : > { %v703_v33 = vadd.f32 %v702_v31, %v3679_v15  ;;  %v791_v34 = vpop.f32.mrf.mxu1 }
  0xf4   : > { %v967_v36 = vadd.f32 %v966_v30, %v878_v29 }
  0xf5   : > { %v792_v37 = vadd.f32 %v791_v34, %v703_v33  ;;  %741 = vmatmul.bf16.gmra.mxu0 %v2579_v27  ;;  %v2594_v33 = vld [vmem:[%s3526_s8 + $0xe0] sm:$0xf]  ;;  %v3028_v34 = vld [vmem:[%s3526_s8 + $0xe4] sm:$0xf0] }
  0xf6   : > { %v1044_v39 = vmax.f32 %v967_v36, 0.0  ;;  %830 = vmatmul.bf16.gmra.mxu1 %v2583_v32  ;;  %919 = vmatmul.bf16.gmra.mxu2 %v2579_v27  ;;  %v2595_v41 = vor.u32 %v3028_v34, %v2594_v33 }
  0xf7   : > { %1008 = vmatmul.bf16.gmra.mxu3 %v2583_v32  ;;  %v1045_v61 = vmax.f32 %v792_v37, 0.0 }
  0xf8   : > { %v3792_v45 = vpack.c.bf16 %v1044_v39, %v1042_v38  ;;  %v3027_v38 = vld [vmem:[%s3526_s8 + $0xe4] sm:$0xf]  ;;  %v2596_v39 = vld [vmem:[%s3526_s8 + $0xe8] sm:$0xf0] }
  0xf9   : > { %v880_v46 = vpop.f32.mrf.mxu2  ;;  %v2599_v47 = vor.u32 %v3027_v38, %v2596_v39 }
  0xfa   : > { %v881_v48 = vadd.f32 %v880_v46, %v3684_v24  ;;  %v969_v49 = vpop.f32.mrf.mxu3  ;;  %v704_v51 = vpop.f32.mrf.mxu0 }
  0xfb   : > { %v705_v52 = vadd.f32 %v704_v51, %v3679_v15  ;;  %v793_v53 = vpop.f32.mrf.mxu1 }
  0xfc   : > { %v970_v54 = vadd.f32 %v969_v49, %v881_v48 }
  0xfd   : > { %v794_v55 = vadd.f32 %v793_v53, %v705_v52 }
  0xfe   : > { %v1046_v20 = vmax.f32 %v970_v54, 0.0 }
  0xff   : > { %v1047_v62 = vmax.f32 %v794_v55, 0.0  ;;  %v3109_v55 = vld [vmem:[%s4547_s5 + $0x74] sm:$0xf] }
 0x100   : > { %v2927_v57 = vor.u32 %v3109_v55, %v2924_v56 }
 0x101   : > { %v882_v5 = vpop.f32.mrf.mxu2  ;;  %v3812_v9 = vpack.c.bf16 %v1047_v62, %v1045_v61 }
 0x102   : > { %v883_v10 = vadd.f32 %v882_v5, %v3684_v24  ;;  %v971_v11 = vpop.f32.mrf.mxu3  ;;  %v707_v12 = vpop.f32.mrf.mxu0  ;;  %2087 = vmatpush.bf16.msra.mxu2 %v2927_v57 }
 0x103   : > { %v708_v14 = vadd.f32 %v707_v12, %v3679_v15  ;;  %v796_v16 = vpop.f32.mrf.mxu1  ;;  %v3029_v12 = vld [vmem:[%s3526_s8 + $0xf4] sm:$0xf] }
 0x104   : > { %v972_v17 = vadd.f32 %v971_v11, %v883_v10  ;;  %v2602_v10 = vld [vmem:[%s3526_s8 + $0xf0] sm:$0xf]  ;;  %v3030_v11 = vld [vmem:[%s3526_s8 + $0xf4] sm:$0xf0] }
 0x105   : > { %v797_v19 = vadd.f32 %v796_v16, %v708_v14  ;;  %746 = vmatmul.bf16.gmra.mxu0 %v2587_v6 }
 0x106   : > { %v1048_v21 = vmax.f32 %v972_v17, 0.0  ;;  %835 = vmatmul.bf16.gmra.mxu1 %v2591_v13  ;;  %924 = vmatmul.bf16.gmra.mxu2 %v2587_v6  ;;  %v2922_v17 = vld [vmem:[%s4547_s5 + $0x70] sm:$0xf] }
 0x107   : > { %1013 = vmatmul.bf16.gmra.mxu3 %v2591_v13  ;;  %v1049_v36 = vmax.f32 %v797_v19, 0.0  ;;  %v2604_v13 = vld [vmem:[%s3526_s8 + $0xf8] sm:$0xf0]  ;;  %v3110_v19 = vld [vmem:[%s4547_s5 + $0x74] sm:$0xf0]  ;;  %s3186_s8 = scalar_lea.hbm %s3185_s22, 512 }
 0x108   : > { %v3816_v22 = vpack.c.bf16 %v1048_v21, %v1046_v20  ;;  %v2923_v20 = vor.u32 %v3110_v19, %v2922_v17  ;;  %v2986_v21 = vld [vmem:[%s4547_s5 + $0xf0] sm:$0xf]  ;;  %v2607_v33 = vor.u32 %v3029_v12, %v2604_v13  ;;  %p3187_p11 = scmp.ne.s32.totalorder %s3185_s22, %s3186_s8  ;;  %p3192_p1 = scmp.lt.s32.totalorder %s3190_s13, %s3186_s8 }
 0x109   : > { %v885_v23 = vpop.f32.mrf.mxu2 }
 0x10a   : > { %v886_v25 = vadd.f32 %v885_v23, %v3684_v24  ;;  %v974_v26 = vpop.f32.mrf.mxu3  ;;  %v709_v27 = vpop.f32.mrf.mxu0  ;;  %v3126_v23 = vld [vmem:[%s4547_s5 + $0xf4] sm:$0xf0]  ;;  %1909 = vmatpush.bf16.msra.mxu0 %v2923_v20  ;;  %p3188_p12 = pnand %p3187_p11, %p3314_p5  ;;  %p3193_p2 = por %p3192_p1, %p3191_p0 }
 0x10b   : > { %v710_v29 = vadd.f32 %v709_v27, %v3679_v15  ;;  %v798_v30 = vpop.f32.mrf.mxu1  ;;  %v2987_v27 = vor.u32 %v3126_v23, %v2986_v21 }
 0x10c   : > { %v975_v31 = vadd.f32 %v974_v26, %v886_v25  ;;  %v2603_v26 = vor.u32 %v3030_v11, %v2602_v10  ;;  %v3123_v10 = vld [vmem:[%s4547_s5 + $0xe4] sm:$0xf]  ;;  %v2980_v11 = vld [vmem:[%s4547_s5 + $0xe8] sm:$0xf0]  ;;  %p3189_p13 = pneg %p3188_p12 }
 0x10d   : > { %v799_v32 = vadd.f32 %v798_v30, %v710_v29  ;;  %1998 = vmatpush.bf16.msra.mxu1 %v2987_v27  ;;  %v2983_v12 = vor.u32 %v3123_v10, %v2980_v11  ;;  %v3108_v27 = vld [vmem:[%s4547_s5 + $0x64] sm:$0xf0] }
 0x10e   : > { %v1050_v53 = vmax.f32 %v975_v31, 0.0  ;;  %p3194_p3 = pnand %p3193_p2, %p3189_p13 }
 0x10f   : > { %v1051_v37 = vmax.f32 %v799_v32, 0.0  ;;  %2177 = vmatpush.bf16.msra.mxu3 %v2983_v12  ;;  %v2908_v12 = vld [vmem:[%s4547_s5 + $0x58] sm:$0xf0] }
 0x111   : > { %v887_v40 = vpop.f32.mrf.mxu2  ;;  %v3824_v42 = vpack.c.bf16 %v1051_v37, %v1049_v36 }
 0x112   : > { %v888_v43 = vadd.f32 %v887_v40, %v3684_v24  ;;  %v976_v44 = vpop.f32.mrf.mxu3  ;;  %v712_v46 = vpop.f32.mrf.mxu0 }
 0x113   : > { %v713_v48 = vadd.f32 %v712_v46, %v3679_v15  ;;  %v801_v49 = vpop.f32.mrf.mxu1 }
 0x114   : > { %v977_v51 = vadd.f32 %v976_v44, %v888_v43 }
 0x115   : > { %v802_v52 = vadd.f32 %v801_v49, %v713_v48  ;;  %751 = vmatmul.bf16.gmra.mxu0 %v2595_v41 }
 0x116   : > { %v1052_v54 = vmax.f32 %v977_v51, 0.0  ;;  %840 = vmatmul.bf16.gmra.mxu1 %v2599_v47  ;;  %929 = vmatmul.bf16.gmra.mxu2 %v2595_v41 }
 0x117   : > { %1018 = vmatmul.bf16.gmra.mxu3 %v2599_v47  ;;  %v1053_v14 = vmax.f32 %v802_v52, 0.0 }
 0x118   : > { %v3840_v61 = vpack.c.bf16 %v1052_v54, %v1050_v53 }
 0x119   : > { %v890_v62 = vpop.f32.mrf.mxu2 }
 0x11a   : > { %v891_v1 = vadd.f32 %v890_v62, %v3684_v24  ;;  %v979_v2 = vpop.f32.mrf.mxu3  ;;  %v714_v3 = vpop.f32.mrf.mxu0 }
 0x11b   : > { %v715_v4 = vadd.f32 %v714_v3, %v3679_v15  ;;  %v803_v5 = vpop.f32.mrf.mxu1 }
 0x11c   : > { %v980_v6 = vadd.f32 %v979_v2, %v891_v1 }
 0x11d   : > { %v804_v7 = vadd.f32 %v803_v5, %v715_v4  ;;  %v3107_v5 = vld [vmem:[%s4547_s5 + $0x64] sm:$0xf] }
 0x11e   : > { %v1054_v39 = vmax.f32 %v980_v6, 0.0  ;;  %v2916_v6 = vld [vmem:[%s4547_s5 + $0x68] sm:$0xf0] }
 0x11f   : > { %v1055_v16 = vmax.f32 %v804_v7, 0.0  ;;  %v2919_v7 = vor.u32 %v3107_v5, %v2916_v6 }
 0x121   : > { %v892_v25 = vpop.f32.mrf.mxu2  ;;  %v3860_v29 = vpack.c.bf16 %v1055_v16, %v1053_v14  ;;  %2088 = vmatpush.bf16.msra.mxu2 %v2919_v7 }
 0x122   : > { %v893_v30 = vadd.f32 %v892_v25, %v3684_v24  ;;  %v981_v31 = vpop.f32.mrf.mxu3  ;;  %v717_v32 = vpop.f32.mrf.mxu0 }
 0x123   : > { %v718_v34 = vadd.f32 %v717_v32, %v3679_v15  ;;  %v806_v36 = vpop.f32.mrf.mxu1  ;;  %v3124_v32 = vld [vmem:[%s4547_s5 + $0xe4] sm:$0xf0] }
 0x124   : > { %v982_v37 = vadd.f32 %v981_v31, %v893_v30  ;;  %v2978_v31 = vld [vmem:[%s4547_s5 + $0xe0] sm:$0xf] }
 0x125   : > { %v807_v38 = vadd.f32 %v806_v36, %v718_v34  ;;  %756 = vmatmul.bf16.gmra.mxu0 %v2603_v26  ;;  %v2979_v34 = vor.u32 %v3124_v32, %v2978_v31  ;;  %v2906_v32 = vld [vmem:[%s4547_s5 + $0x50] sm:$0xf] }
 0x126   : > { %v1056_v40 = vmax.f32 %v982_v37, 0.0  ;;  %845 = vmatmul.bf16.gmra.mxu1 %v2607_v33  ;;  %934 = vmatmul.bf16.gmra.mxu2 %v2603_v26  ;;  %v2914_v26 = vld [vmem:[%s4547_s5 + $0x60] sm:$0xf] }
 0x127   : > { %1023 = vmatmul.bf16.gmra.mxu3 %v2607_v33  ;;  %v1057_v53 = vmax.f32 %v807_v38, 0.0  ;;  %v2915_v30 = vor.u32 %v3108_v27, %v2914_v26  ;;  %1999 = vmatpush.bf16.msra.mxu1 %v2979_v34 }
 0x128   : > { %v3864_v41 = vpack.c.bf16 %v1056_v40, %v1054_v39 }
 0x129   : > { %v895_v43 = vpop.f32.mrf.mxu2  ;;  %1910 = vmatpush.bf16.msra.mxu0 %v2915_v30 }
 0x12a   : > { %v896_v44 = vadd.f32 %v895_v43, %v3684_v24  ;;  %v984_v46 = vpop.f32.mrf.mxu3  ;;  %v719_v47 = vpop.f32.mrf.mxu0 }
 0x12b   : > { %v720_v48 = vadd.f32 %v719_v47, %v3679_v15  ;;  %v808_v49 = vpop.f32.mrf.mxu1 }
 0x12c   : > { %v985_v51 = vadd.f32 %v984_v46, %v896_v44 }
 0x12d   : > { %v809_v52 = vadd.f32 %v808_v49, %v720_v48 }
 0x12e   : > { %v1058_v3 = vmax.f32 %v985_v51, 0.0 }
 0x12f   : > { %v1059_v54 = vmax.f32 %v809_v52, 0.0 }
 0x131   : > { %v897_v55 = vpop.f32.mrf.mxu2  ;;  %v3868_v56 = vpack.c.bf16 %v1059_v54, %v1057_v53 }
 0x132   : > { %v898_v57 = vadd.f32 %v897_v55, %v3684_v24  ;;  %v986_v58 = vpop.f32.mrf.mxu3  ;;  %v722_v59 = vpop.f32.mrf.mxu0 }
 0x133   : > { %v723_v62 = vadd.f32 %v722_v59, %v3679_v15  ;;  %v811_v63 = vpop.f32.mrf.mxu1 }
 0x134   : > { %v987_v1 = vadd.f32 %v986_v58, %v898_v57 }
 0x135   : > { %v812_v2 = vadd.f32 %v811_v63, %v723_v62  ;;  %1331 = vmatmul.bf16.vlgmr.msrb.gmra.mxu0 %v3716_v50 }
 0x136   : > { %v1060_v4 = vmax.f32 %v987_v1, 0.0  ;;  %1420 = vmatmul.bf16.vlgmr.msrb.gmra.mxu1 %v3720_v0  ;;  %1509 = vmatmul.bf16.vlgmr.msrb.gmra.mxu2 %v3716_v50 }
 0x137   : > { %1598 = vmatmul.bf16.vlgmr.msrb.gmra.mxu3 %v3720_v0  ;;  %v1061_v23 = vmax.f32 %v812_v2, 0.0 }
 0x138   : > { %v3888_v50 = vpack.c.bf16 %v1060_v4, %v1058_v3 }
 0x139   : > { %v900_v0 = vpop.f32.mrf.mxu2 }
 0x13a   : > { %v901_v13 = vadd.f32 %v900_v0, %v3684_v24  ;;  %v989_v14 = vpop.f32.mrf.mxu3  ;;  %v724_v16 = vpop.f32.mrf.mxu0  ;;  %v3105_v0 = vld [vmem:[%s4547_s5 + $0x54] sm:$0xf] }
 0x13b   : > { %v725_v17 = vadd.f32 %v724_v16, %v3679_v15  ;;  %v813_v19 = vpop.f32.mrf.mxu1  ;;  %v2972_v16 = vld [vmem:[%s4547_s5 + $0xd8] sm:$0xf0] }
 0x13c   : > { %v990_v20 = vadd.f32 %v989_v14, %v901_v13  ;;  %v2911_v13 = vor.u32 %v3105_v0, %v2908_v12  ;;  %v3121_v14 = vld [vmem:[%s4547_s5 + $0xd4] sm:$0xf] }
 0x13d   : > { %v814_v21 = vadd.f32 %v813_v19, %v725_v17  ;;  %v2975_v17 = vor.u32 %v3121_v14, %v2972_v16 }
 0x13e   : > { %v1062_v47 = vmax.f32 %v990_v20, 0.0  ;;  %2089 = vmatpush.bf16.msra.mxu2 %v2911_v13 }
 0x13f   : > { %v1063_v25 = vmax.f32 %v814_v21, 0.0  ;;  %2178 = vmatpush.bf16.msra.mxu3 %v2975_v17  ;;  %v2900_v17 = vld [vmem:[%s4547_s5 + $0x48] sm:$0xf0] }
 0x141   : > { %v902_v33 = vpop.f32.mrf.mxu2  ;;  %v3904_v36 = vpack.c.bf16 %v1063_v25, %v1061_v23 }
 0x142   : > { %v903_v37 = vadd.f32 %v902_v33, %v3684_v24  ;;  %v991_v38 = vpop.f32.mrf.mxu3  ;;  %v727_v39 = vpop.f32.mrf.mxu0  ;;  %v3106_v33 = vld [vmem:[%s4547_s5 + $0x54] sm:$0xf0] }
 0x143   : > { %v728_v40 = vadd.f32 %v727_v39, %v3679_v15  ;;  %v816_v43 = vpop.f32.mrf.mxu1  ;;  %v2907_v34 = vor.u32 %v3106_v33, %v2906_v32 }
 0x144   : > { %v992_v44 = vadd.f32 %v991_v38, %v903_v37  ;;  %v2970_v37 = vld [vmem:[%s4547_s5 + $0xd0] sm:$0xf]  ;;  %v3122_v38 = vld [vmem:[%s4547_s5 + $0xd4] sm:$0xf0] }
 0x145   : > { %v817_v46 = vadd.f32 %v816_v43, %v728_v40  ;;  %1336 = vmatmul.bf16.gmra.mxu0 %v3728_v18  ;;  %v2971_v40 = vor.u32 %v3122_v38, %v2970_v37  ;;  %v2898_v38 = vld [vmem:[%s4547_s5 + $0x40] sm:$0xf] }
 0x146   : > { %v1064_v48 = vmax.f32 %v992_v44, 0.0  ;;  %1425 = vmatmul.bf16.gmra.mxu1 %v3744_v35  ;;  %1514 = vmatmul.bf16.gmra.mxu2 %v3728_v18 }
 0x147   : > { %1603 = vmatmul.bf16.gmra.mxu3 %v3744_v35  ;;  %v1065_v62 = vmax.f32 %v817_v46, 0.0  ;;  %1911 = vmatpush.bf16.msra.mxu0 %v2907_v34 }
 0x148   : > { %v3912_v49 = vpack.c.bf16 %v1064_v48, %v1062_v47  ;;  %2000 = vmatpush.bf16.msra.mxu1 %v2971_v40 }
 0x149   : > { %v905_v51 = vpop.f32.mrf.mxu2 }
 0x14a   : > { %v906_v52 = vadd.f32 %v905_v51, %v3684_v24  ;;  %v994_v53 = vpop.f32.mrf.mxu3  ;;  %v729_v54 = vpop.f32.mrf.mxu0 }
 0x14b   : > { %v730_v55 = vadd.f32 %v729_v54, %v3679_v15  ;;  %v818_v57 = vpop.f32.mrf.mxu1 }
 0x14c   : > { %v995_v58 = vadd.f32 %v994_v53, %v906_v52 }
 0x14d   : > { %v819_v59 = vadd.f32 %v818_v57, %v730_v55 }
 0x14e   : > { %v1066_v10 = vmax.f32 %v995_v58, 0.0 }
 0x14f   : > { %v1067_v63 = vmax.f32 %v819_v59, 0.0 }
 0x151   : > { %v907_v1 = vpop.f32.mrf.mxu2  ;;  %v3916_v2 = vpack.c.bf16 %v1067_v63, %v1065_v62 }
 0x152   : > { %v908_v18 = vadd.f32 %v907_v1, %v3684_v24  ;;  %v996_v35 = vpop.f32.mrf.mxu3  ;;  %v732_v3 = vpop.f32.mrf.mxu0 }
 0x153   : > { %v733_v4 = vadd.f32 %v732_v3, %v3679_v15  ;;  %v821_v5 = vpop.f32.mrf.mxu1 }
 0x154   : > { %v997_v6 = vadd.f32 %v996_v35, %v908_v18 }
 0x155   : > { %v822_v7 = vadd.f32 %v821_v5, %v733_v4  ;;  %1341 = vmatmul.bf16.gmra.mxu0 %v3764_v60 }
 0x156   : > { %v1068_v11 = vmax.f32 %v997_v6, 0.0  ;;  %1430 = vmatmul.bf16.gmra.mxu1 %v3768_v8  ;;  %1519 = vmatmul.bf16.gmra.mxu2 %v3764_v60 }
 0x157   : > { %1608 = vmatmul.bf16.gmra.mxu3 %v3768_v8  ;;  %v1069_v30 = vmax.f32 %v822_v7, 0.0 }
 0x158   : > { %v3936_v60 = vpack.c.bf16 %v1068_v11, %v1066_v10 }
 0x159   : > { %v910_v8 = vpop.f32.mrf.mxu2 }
 0x15a   : > { %v911_v19 = vadd.f32 %v910_v8, %v3684_v24  ;;  %v999_v20 = vpop.f32.mrf.mxu3  ;;  %v734_v21 = vpop.f32.mrf.mxu0  ;;  %v3103_v8 = vld [vmem:[%s4547_s5 + $0x44] sm:$0xf] }
 0x15b   : > { %v735_v23 = vadd.f32 %v734_v21, %v3679_v15  ;;  %v823_v25 = vpop.f32.mrf.mxu1  ;;  %v2964_v21 = vld [vmem:[%s4547_s5 + $0xc8] sm:$0xf0] }
 0x15c   : > { %v1000_v26 = vadd.f32 %v999_v20, %v911_v19  ;;  %v2903_v19 = vor.u32 %v3103_v8, %v2900_v17  ;;  %v3119_v20 = vld [vmem:[%s4547_s5 + $0xc4] sm:$0xf] }
 0x15d   : > { %v824_v27 = vadd.f32 %v823_v25, %v735_v23  ;;  %v2967_v23 = vor.u32 %v3119_v20, %v2964_v21 }
 0x15e   : > { %v1070_v54 = vmax.f32 %v1000_v26, 0.0  ;;  %2090 = vmatpush.bf16.msra.mxu2 %v2903_v19 }
 0x15f   : > { %v1071_v31 = vmax.f32 %v824_v27, 0.0  ;;  %2179 = vmatpush.bf16.msra.mxu3 %v2967_v23  ;;  %v2892_v23 = vld [vmem:[%s4547_s5 + $0x38] sm:$0xf0] }
 0x161   : > { %v912_v39 = vpop.f32.mrf.mxu2  ;;  %v3952_v43 = vpack.c.bf16 %v1071_v31, %v1069_v30 }
 0x162   : > { %v913_v44 = vadd.f32 %v912_v39, %v3684_v24  ;;  %v1001_v46 = vpop.f32.mrf.mxu3  ;;  %v737_v47 = vpop.f32.mrf.mxu0  ;;  %v3104_v39 = vld [vmem:[%s4547_s5 + $0x44] sm:$0xf0] }
 0x163   : > { %v738_v48 = vadd.f32 %v737_v47, %v3679_v15  ;;  %v826_v51 = vpop.f32.mrf.mxu1  ;;  %v2899_v40 = vor.u32 %v3104_v39, %v2898_v38 }
 0x164   : > { %v1002_v52 = vadd.f32 %v1001_v46, %v913_v44  ;;  %v2962_v44 = vld [vmem:[%s4547_s5 + $0xc0] sm:$0xf]  ;;  %v3120_v46 = vld [vmem:[%s4547_s5 + $0xc4] sm:$0xf0] }
 0x165   : > { %v827_v53 = vadd.f32 %v826_v51, %v738_v48  ;;  %1346 = vmatmul.bf16.gmra.mxu0 %v3776_v28  ;;  %v2963_v48 = vor.u32 %v3120_v46, %v2962_v44  ;;  %v2890_v46 = vld [vmem:[%s4547_s5 + $0x30] sm:$0xf] }
 0x166   : > { %v1072_v55 = vmax.f32 %v1002_v52, 0.0  ;;  %1435 = vmatmul.bf16.gmra.mxu1 %v3792_v45  ;;  %1524 = vmatmul.bf16.gmra.mxu2 %v3776_v28 }
 0x167   : > { %1613 = vmatmul.bf16.gmra.mxu3 %v3792_v45  ;;  %v1073_v4 = vmax.f32 %v827_v53, 0.0  ;;  %1912 = vmatpush.bf16.msra.mxu0 %v2899_v40 }
 0x168   : > { %v3960_v57 = vpack.c.bf16 %v1072_v55, %v1070_v54  ;;  %2001 = vmatpush.bf16.msra.mxu1 %v2963_v48 }
 0x169   : > { %v915_v58 = vpop.f32.mrf.mxu2 }
 0x16a   : > { %v916_v59 = vadd.f32 %v915_v58, %v3684_v24  ;;  %v1004_v62 = vpop.f32.mrf.mxu3  ;;  %v739_v63 = vpop.f32.mrf.mxu0 }
 0x16b   : > { %v740_v1 = vadd.f32 %v739_v63, %v3679_v15  ;;  %v828_v18 = vpop.f32.mrf.mxu1 }
 0x16c   : > { %v1005_v35 = vadd.f32 %v1004_v62, %v916_v59 }
 0x16d   : > { %v829_v3 = vadd.f32 %v828_v18, %v740_v1 }
 0x16e   : > { %v1074_v14 = vmax.f32 %v1005_v35, 0.0 }
 0x16f   : > { %v1075_v5 = vmax.f32 %v829_v3, 0.0 }
 0x171   : > { %v917_v6 = vpop.f32.mrf.mxu2  ;;  %v3964_v7 = vpack.c.bf16 %v1075_v5, %v1073_v4 }
 0x172   : > { %v918_v28 = vadd.f32 %v917_v6, %v3684_v24  ;;  %v1006_v45 = vpop.f32.mrf.mxu3  ;;  %v742_v10 = vpop.f32.mrf.mxu0 }
 0x173   : > { %v743_v11 = vadd.f32 %v742_v10, %v3679_v15  ;;  %v831_v0 = vpop.f32.mrf.mxu1 }
 0x174   : > { %v1007_v12 = vadd.f32 %v1006_v45, %v918_v28 }
 0x175   : > { %v832_v13 = vadd.f32 %v831_v0, %v743_v11  ;;  %1351 = vmatmul.bf16.gmra.mxu0 %v3812_v9 }
 0x176   : > { %v1076_v16 = vmax.f32 %v1007_v12, 0.0  ;;  %1440 = vmatmul.bf16.gmra.mxu1 %v3816_v22  ;;  %1529 = vmatmul.bf16.gmra.mxu2 %v3812_v9 }
 0x177   : > { %1618 = vmatmul.bf16.gmra.mxu3 %v3816_v22  ;;  %v1077_v34 = vmax.f32 %v832_v13, 0.0 }
 0x178   : > { %v3984_v9 = vpack.c.bf16 %v1076_v16, %v1074_v14 }
 0x179   : > { %v920_v22 = vpop.f32.mrf.mxu2 }
 0x17a   : > { %v921_v25 = vadd.f32 %v920_v22, %v3684_v24  ;;  %v1009_v26 = vpop.f32.mrf.mxu3  ;;  %v744_v27 = vpop.f32.mrf.mxu0  ;;  %v3101_v22 = vld [vmem:[%s4547_s5 + $0x34] sm:$0xf] }
 0x17b   : > { %v745_v30 = vadd.f32 %v744_v27, %v3679_v15  ;;  %v833_v31 = vpop.f32.mrf.mxu1  ;;  %v2956_v27 = vld [vmem:[%s4547_s5 + $0xb8] sm:$0xf0] }
 0x17c   : > { %v1010_v32 = vadd.f32 %v1009_v26, %v921_v25  ;;  %v2895_v25 = vor.u32 %v3101_v22, %v2892_v23  ;;  %v3117_v26 = vld [vmem:[%s4547_s5 + $0xb4] sm:$0xf] }
 0x17d   : > { %v834_v33 = vadd.f32 %v833_v31, %v745_v30  ;;  %v2959_v30 = vor.u32 %v3117_v26, %v2956_v27 }
 0x17e   : > { %v1078_v63 = vmax.f32 %v1010_v32, 0.0  ;;  %2091 = vmatpush.bf16.msra.mxu2 %v2895_v25 }
 0x17f   : > { %v1079_v37 = vmax.f32 %v834_v33, 0.0  ;;  %2180 = vmatpush.bf16.msra.mxu3 %v2959_v30 }
 0x181   : > { %v922_v47 = vpop.f32.mrf.mxu2  ;;  %v4000_v51 = vpack.c.bf16 %v1079_v37, %v1077_v34 }
 0x182   : > { %v923_v52 = vadd.f32 %v922_v47, %v3684_v24  ;;  %v1011_v53 = vpop.f32.mrf.mxu3  ;;  %v747_v54 = vpop.f32.mrf.mxu0  ;;  %v3102_v47 = vld [vmem:[%s4547_s5 + $0x34] sm:$0xf0] }
 0x183   : > { %v748_v55 = vadd.f32 %v747_v54, %v3679_v15  ;;  %v836_v58 = vpop.f32.mrf.mxu1  ;;  %v2891_v48 = vor.u32 %v3102_v47, %v2890_v46 }
 0x184   : > { %v1012_v59 = vadd.f32 %v1011_v53, %v923_v52  ;;  %v2954_v52 = vld [vmem:[%s4547_s5 + $0xb0] sm:$0xf]  ;;  %v3118_v53 = vld [vmem:[%s4547_s5 + $0xb4] sm:$0xf0] }
 0x185   : > { %v837_v62 = vadd.f32 %v836_v58, %v748_v55  ;;  %1356 = vmatmul.bf16.gmra.mxu0 %v3824_v42  ;;  %v2955_v55 = vor.u32 %v3118_v53, %v2954_v52  ;;  %v2882_v53 = vld [vmem:[%s4547_s5 + $0x20] sm:$0xf] }
 0x186   : > { %v1080_v1 = vmax.f32 %v1012_v59, 0.0  ;;  %1445 = vmatmul.bf16.gmra.mxu1 %v3840_v61  ;;  %1534 = vmatmul.bf16.gmra.mxu2 %v3824_v42 }
 0x187   : > { %1623 = vmatmul.bf16.gmra.mxu3 %v3840_v61  ;;  %v1081_v11 = vmax.f32 %v837_v62, 0.0  ;;  %1913 = vmatpush.bf16.msra.mxu0 %v2891_v48 }
 0x188   : > { %v4008_v18 = vpack.c.bf16 %v1080_v1, %v1078_v63  ;;  %2002 = vmatpush.bf16.msra.mxu1 %v2955_v55  ;;  %v2946_v55 = vld [vmem:[%s4547_s5 + $0xa0] sm:$0xf] }
 0x189   : > { %v925_v35 = vpop.f32.mrf.mxu2 }
 0x18a   : > { %v926_v3 = vadd.f32 %v925_v35, %v3684_v24  ;;  %v1014_v4 = vpop.f32.mrf.mxu3  ;;  %v749_v5 = vpop.f32.mrf.mxu0 }
 0x18b   : > { %v750_v6 = vadd.f32 %v749_v5, %v3679_v15  ;;  %v838_v28 = vpop.f32.mrf.mxu1 }
 0x18c   : > { %v1015_v45 = vadd.f32 %v1014_v4, %v926_v3 }
 0x18d   : > { %v839_v10 = vadd.f32 %v838_v28, %v750_v6 }
 0x18e   : > { %v1082_v20 = vmax.f32 %v1015_v45, 0.0 }
 0x18f   : > { %v1083_v0 = vmax.f32 %v839_v10, 0.0 }
 0x191   : > { %v927_v12 = vpop.f32.mrf.mxu2  ;;  %v4012_v13 = vpack.c.bf16 %v1083_v0, %v1081_v11 }
 0x192   : > { %v928_v42 = vadd.f32 %v927_v12, %v3684_v24  ;;  %v1016_v61 = vpop.f32.mrf.mxu3  ;;  %v752_v14 = vpop.f32.mrf.mxu0 }
 0x193   : > { %v753_v16 = vadd.f32 %v752_v14, %v3679_v15  ;;  %v841_v8 = vpop.f32.mrf.mxu1  ;;  %v1157_v14 = vld [vmem:[%s4546_s4] sm:$0x3] }
 0x194   : > { %v1017_v17 = vadd.f32 %v1016_v61, %v928_v42  ;;  %v4072_v30 = vperm.slane %v1157_v14, 1 }
 0x195   : > { %v842_v19 = vadd.f32 %v841_v8, %v753_v16  ;;  %1361 = vmatmul.bf16.gmra.mxu0 %v3860_v29 }
 0x196   : > { %v1084_v21 = vmax.f32 %v1017_v17, 0.0  ;;  %1450 = vmatmul.bf16.gmra.mxu1 %v3864_v41  ;;  %1539 = vmatmul.bf16.gmra.mxu2 %v3860_v29  ;;  %v4063_v17 = vperm.slane %v1157_v14, 0 }
 0x197   : > { %1628 = vmatmul.bf16.gmra.mxu3 %v3864_v41  ;;  %v1085_v40 = vmax.f32 %v842_v19, 0.0 }
 0x198   : > { %v4032_v29 = vpack.c.bf16 %v1084_v21, %v1082_v20 }
 0x199   : > { %v930_v41 = vpop.f32.mrf.mxu2 }
 0x19a   : > { %v931_v31 = vadd.f32 %v930_v41, %v3684_v24  ;;  %v1019_v32 = vpop.f32.mrf.mxu3  ;;  %v754_v33 = vpop.f32.mrf.mxu0 }
 0x19b   : > { %v755_v34 = vadd.f32 %v754_v33, %v3679_v15  ;;  %v843_v37 = vpop.f32.mrf.mxu1 }
 0x19c   : > { %v1020_v38 = vadd.f32 %v1019_v32, %v931_v31  ;;  %v2884_v31 = vld [vmem:[%s4547_s5 + $0x28] sm:$0xf0]  ;;  %v3115_v32 = vld [vmem:[%s4547_s5 + $0xa4] sm:$0xf] }
 0x19d   : > { %v844_v39 = vadd.f32 %v843_v37, %v755_v34 }
 0x19e   : > { %v1086_v5 = vmax.f32 %v1020_v38, 0.0 }
 0x19f   : > { %v1087_v44 = vmax.f32 %v844_v39, 0.0 }
 0x1a1   : > { %v932_v54 = vpop.f32.mrf.mxu2  ;;  %v4048_v58 = vpack.c.bf16 %v1087_v44, %v1085_v40 }
 0x1a2   : > { %v933_v59 = vadd.f32 %v932_v54, %v3684_v24  ;;  %v1021_v62 = vpop.f32.mrf.mxu3  ;;  %v757_v63 = vpop.f32.mrf.mxu0  ;;  %v3100_v54 = vld [vmem:[%s4547_s5 + $0x24] sm:$0xf0] }
 0x1a3   : > { %v758_v1 = vadd.f32 %v757_v63, %v3679_v15  ;;  %v846_v35 = vpop.f32.mrf.mxu1 }
 0x1a4   : > { %v1022_v3 = vadd.f32 %v1021_v62, %v933_v59  ;;  %v2883_v59 = vor.u32 %v3100_v54, %v2882_v53  ;;  %v3116_v62 = vld [vmem:[%s4547_s5 + $0xa4] sm:$0xf0]  ;;  %v3114_v54 = vld [vmem:[%s4547_s5 + $0x94] sm:$0xf0] }
 0x1a5   : > { %v847_v4 = vadd.f32 %v846_v35, %v758_v1  ;;  %1366 = vmatmul.bf16.gmra.mxu0 %v3868_v56  ;;  %v2947_v1 = vor.u32 %v3116_v62, %v2946_v55 }
 0x1a6   : > { %v1088_v6 = vmax.f32 %v1022_v3, 0.0  ;;  %1455 = vmatmul.bf16.gmra.mxu1 %v3888_v50  ;;  %1544 = vmatmul.bf16.gmra.mxu2 %v3868_v56 }
 0x1a7   : > { %1633 = vmatmul.bf16.gmra.mxu3 %v3888_v50  ;;  %v1089_v8 = vmax.f32 %v847_v4, 0.0  ;;  %1914 = vmatpush.bf16.msra.mxu0 %v2883_v59 }
 0x1a8   : > { %v4056_v28 = vpack.c.bf16 %v1088_v6, %v1086_v5  ;;  %2003 = vmatpush.bf16.msra.mxu1 %v2947_v1 }
 0x1a9   : > { %v935_v45 = vpop.f32.mrf.mxu2 }
 0x1aa   : > { %v936_v10 = vadd.f32 %v935_v45, %v3684_v24  ;;  %v1024_v11 = vpop.f32.mrf.mxu3  ;;  %v759_v0 = vpop.f32.mrf.mxu0 }
 0x1ab   : > { %v760_v12 = vadd.f32 %v759_v0, %v3679_v15  ;;  %v848_v42 = vpop.f32.mrf.mxu1 }
 0x1ac   : > { %v1025_v61 = vadd.f32 %v1024_v11, %v936_v10 }
 0x1ad   : > { %v849_v16 = vadd.f32 %v848_v42, %v760_v12 }
 0x1ae   : > { %v1090_v27 = vmax.f32 %v1025_v61, 0.0 }
 0x1af   : > { %v1091_v56 = vmax.f32 %v849_v16, 0.0 }
 0x1b1   : > { %v937_v50 = vpop.f32.mrf.mxu2  ;;  %v4065_v19 = vpack.c.bf16 %v1091_v56, %v1089_v8 }
 0x1b2   : > { %v938_v20 = vadd.f32 %v937_v50, %v3684_v24  ;;  %v1026_v21 = vpop.f32.mrf.mxu3  ;;  %v1332_v22 = vpop.f32.mrf.mxu0  ;;  %v3099_v24 = vld [vmem:[%s4547_s5 + $0x24] sm:$0xf] }
 0x1b3   : > { %v1333_v15 = vadd.f32 %v1332_v22, %v4063_v17  ;;  %v1421_v23 = vpop.f32.mrf.mxu1  ;;  %v2887_v33 = vor.u32 %v3099_v24, %v2884_v31  ;;  %v3113_v24 = vld [vmem:[%s4547_s5 + $0x94] sm:$0xf] }
 0x1b4   : > { %v1027_v25 = vadd.f32 %v1026_v21, %v938_v20 }
 0x1b5   : > { %v1422_v26 = vadd.f32 %v1421_v23, %v1333_v15  ;;  %1371 = vmatmul.bf16.gmra.mxu0 %v3904_v36  ;;  %2092 = vmatpush.bf16.msra.mxu2 %v2887_v33 }
 0x1b6   : > { %v1092_v41 = vmax.f32 %v1027_v25, 0.0  ;;  %1460 = vmatmul.bf16.gmra.mxu1 %v3912_v49  ;;  %1549 = vmatmul.bf16.gmra.mxu2 %v3904_v36  ;;  %v2948_v36 = vld [vmem:[%s4547_s5 + $0xa8] sm:$0xf0] }
 0x1b7   : > { %1638 = vmatmul.bf16.gmra.mxu3 %v3912_v49  ;;  %v2951_v37 = vor.u32 %v3115_v32, %v2948_v36  ;;  %v2940_v32 = vld [vmem:[%s4547_s5 + $0x98] sm:$0xf0] }
 0x1b8   : > { %v4087_v34 = vpack.c.bf16 %v1092_v41, %v1090_v27  ;;  %v3097_v27 = vld [vmem:[%s4547_s5 + $0x14] sm:$0xf]  ;;  %v2876_v41 = vld [vmem:[%s4547_s5 + $0x18] sm:$0xf0]  ;;  %v2943_v33 = vor.u32 %v3113_v24, %v2940_v32  ;;  %v2932_v24 = vld [vmem:[%s4547_s5 + $0x88] sm:$0xf0] }
 0x1b9   : > { %v1510_v49 = vpop.f32.mrf.mxu2  ;;  %2181 = vmatpush.bf16.msra.mxu3 %v2951_v37  ;;  %v2879_v31 = vor.u32 %v3097_v27, %v2876_v41  ;;  %v3111_v27 = vld [vmem:[%s4547_s5 + $0x84] sm:$0xf] }
 0x1ba   : > { %v1511_v38 = vadd.f32 %v1510_v49, %v4072_v30  ;;  %v1599_v39 = vpop.f32.mrf.mxu3  ;;  %v1334_v40 = vpop.f32.mrf.mxu0 }
 0x1bb   : > { %v1335_v44 = vadd.f32 %v1334_v40, %v4063_v17  ;;  %v1423_v46 = vpop.f32.mrf.mxu1  ;;  %2093 = vmatpush.bf16.msra.mxu2 %v2879_v31  ;;  %v2935_v31 = vor.u32 %v3111_v27, %v2932_v24 }
 0x1bc   : > { %v1600_v47 = vadd.f32 %v1599_v39, %v1511_v38 }
 0x1bd   : > { %v1424_v48 = vadd.f32 %v1423_v46, %v1335_v44  ;;  %2182 = vmatpush.bf16.msra.mxu3 %v2943_v33  ;;  %v2874_v46 = vld [vmem:[%s4547_s5 + $0x10] sm:$0xf] }
 0x1bf   : > { %v4091_v52 = vpack.c.bf16 %v1424_v48, %v1422_v26  ;;  %v2938_v48 = vld [vmem:[%s4547_s5 + $0x90] sm:$0xf] }
 0x1c0   : > { %v2939_v59 = vor.u32 %v3114_v54, %v2938_v48 }
 0x1c1   : > { %v1512_v63 = vpop.f32.mrf.mxu2  ;;  %2183 = vmatpush.bf16.msra.mxu3 %v2935_v31 }
 0x1c2   : > { %v1513_v35 = vadd.f32 %v1512_v63, %v4072_v30  ;;  %v1601_v3 = vpop.f32.mrf.mxu3  ;;  %v1337_v4 = vpop.f32.mrf.mxu0  ;;  %2004 = vmatpush.bf16.msra.mxu1 %v2939_v59 }
 0x1c3   : > { %v1338_v5 = vadd.f32 %v1337_v4, %v4063_v17  ;;  %v1426_v6 = vpop.f32.mrf.mxu1 }
 0x1c4   : > { %v1602_v45 = vadd.f32 %v1601_v3, %v1513_v35 }
 0x1c5   : > { %v1427_v10 = vadd.f32 %v1426_v6, %v1338_v5  ;;  %1376 = vmatmul.bf16.gmra.mxu0 %v3916_v2 }
 0x1c6   : > { %v4108_v11 = vpack.c.bf16 %v1602_v45, %v1600_v47  ;;  %1465 = vmatmul.bf16.gmra.mxu1 %v3936_v60  ;;  %1554 = vmatmul.bf16.gmra.mxu2 %v3916_v2  ;;  %v3098_v47 = vld [vmem:[%s4547_s5 + $0x14] sm:$0xf0] }
 0x1c7   : > { %1643 = vmatmul.bf16.gmra.mxu3 %v3936_v60  ;;  %v2875_v53 = vor.u32 %v3098_v47, %v2874_v46  ;;  %v3112_v47 = vld [vmem:[%s4547_s5 + $0x84] sm:$0xf0] }
 0x1c9   : > { %v1515_v0 = vpop.f32.mrf.mxu2  ;;  %1915 = vmatpush.bf16.msra.mxu0 %v2875_v53 }
 0x1ca   : > { %v1516_v12 = vadd.f32 %v1515_v0, %v4072_v30  ;;  %v1604_v42 = vpop.f32.mrf.mxu3  ;;  %v1339_v61 = vpop.f32.mrf.mxu0 }
 0x1cb   : > { %v1340_v14 = vadd.f32 %v1339_v61, %v4063_v17  ;;  %v1428_v16 = vpop.f32.mrf.mxu1 }
 0x1cc   : > { %v1605_v8 = vadd.f32 %v1604_v42, %v1516_v12 }
 0x1cd   : > { %v1429_v56 = vadd.f32 %v1428_v16, %v1340_v14 }
 0x1cf   : > { %v4115_v50 = vpack.c.bf16 %v1429_v56, %v1427_v10 }
 0x1d1   : > { %v1517_v20 = vpop.f32.mrf.mxu2 }
 0x1d2   : > { %v1518_v21 = vadd.f32 %v1517_v20, %v4072_v30  ;;  %v1606_v22 = vpop.f32.mrf.mxu3  ;;  %v1342_v15 = vpop.f32.mrf.mxu0 }
 0x1d3   : > { %v1343_v2 = vadd.f32 %v1342_v15, %v4063_v17  ;;  %v1431_v60 = vpop.f32.mrf.mxu1 }
 0x1d4   : > { %v1607_v23 = vadd.f32 %v1606_v22, %v1518_v21 }
 0x1d5   : > { %v1432_v25 = vadd.f32 %v1431_v60, %v1343_v2  ;;  %1381 = vmatmul.bf16.gmra.mxu0 %v3952_v43 }
 0x1d6   : > { %v4120_v26 = vpack.c.bf16 %v1607_v23, %v1605_v8  ;;  %1470 = vmatmul.bf16.gmra.mxu1 %v3960_v57  ;;  %1559 = vmatmul.bf16.gmra.mxu2 %v3952_v43  ;;  %v3095_v23 = vld [vmem:[%s4547_s5 + $0x4] sm:$0xf] }
 0x1d7   : > { %1648 = vmatmul.bf16.gmra.mxu3 %v3960_v57 }
 0x1d9   : > { %v1520_v43 = vpop.f32.mrf.mxu2 }
 0x1da   : > { %v1521_v57 = vadd.f32 %v1520_v43, %v4072_v30  ;;  %v1609_v36 = vpop.f32.mrf.mxu3  ;;  %v1344_v49 = vpop.f32.mrf.mxu0 }
 0x1db   : > { %v1345_v37 = vadd.f32 %v1344_v49, %v4063_v17  ;;  %v1433_v38 = vpop.f32.mrf.mxu1 }
 0x1dc   : > { %v1610_v39 = vadd.f32 %v1609_v36, %v1521_v57 }
 0x1dd   : > { %v1434_v40 = vadd.f32 %v1433_v38, %v1345_v37  ;;  %v2866_v38 = vld [vmem:[%s4547_s5] sm:$0xf] }
 0x1df   : > { %v4139_v44 = vpack.c.bf16 %v1434_v40, %v1432_v25  ;;  %v2868_v25 = vld [vmem:[%s4547_s5 + $0x8] sm:$0xf0]  ;;  %v2930_v40 = vld [vmem:[%s4547_s5 + $0x80] sm:$0xf] }
 0x1e0   : > { %v2871_v41 = vor.u32 %v3095_v23, %v2868_v25  ;;  %v2931_v53 = vor.u32 %v3112_v47, %v2930_v40 }
 0x1e1   : > { %v1522_v55 = vpop.f32.mrf.mxu2 }
 0x1e2   : > { %v1523_v62 = vadd.f32 %v1522_v55, %v4072_v30  ;;  %v1611_v63 = vpop.f32.mrf.mxu3  ;;  %v1347_v1 = vpop.f32.mrf.mxu0  ;;  %2094 = vmatpush.bf16.msra.mxu2 %v2871_v41  ;;  %2005 = vmatpush.bf16.msra.mxu1 %v2931_v53 }
 0x1e3   : > { %v1348_v35 = vadd.f32 %v1347_v1, %v4063_v17  ;;  %v1436_v3 = vpop.f32.mrf.mxu1 }
 0x1e4   : > { %v1612_v4 = vadd.f32 %v1611_v63, %v1523_v62 }
 0x1e5   : > { %v1437_v5 = vadd.f32 %v1436_v3, %v1348_v35  ;;  %1386 = vmatmul.bf16.gmra.mxu0 %v3964_v7 }
 0x1e6   : > { %v4156_v6 = vpack.c.bf16 %v1612_v4, %v1610_v39  ;;  %1475 = vmatmul.bf16.gmra.mxu1 %v3984_v9  ;;  %1564 = vmatmul.bf16.gmra.mxu2 %v3964_v7  ;;  %v3096_v39 = vld [vmem:[%s4547_s5 + $0x4] sm:$0xf0] }
 0x1e7   : > { %1653 = vmatmul.bf16.gmra.mxu3 %v3984_v9  ;;  %v2867_v46 = vor.u32 %v3096_v39, %v2866_v38 }
 0x1e9   : > { %v1525_v45 = vpop.f32.mrf.mxu2  ;;  %1916 = vmatpush.bf16.msra.mxu0 %v2867_v46 }
 0x1ea   : > { %v1526_v10 = vadd.f32 %v1525_v45, %v4072_v30  ;;  %v1614_v0 = vpop.f32.mrf.mxu3  ;;  %v1349_v12 = vpop.f32.mrf.mxu0 }
 0x1eb   : > { %v1350_v42 = vadd.f32 %v1349_v12, %v4063_v17  ;;  %v1438_v61 = vpop.f32.mrf.mxu1 }
 0x1ec   : > { %v1615_v14 = vadd.f32 %v1614_v0, %v1526_v10 }
 0x1ed   : > { %v1439_v16 = vadd.f32 %v1438_v61, %v1350_v42 }
 0x1ef   : > { %v4163_v8 = vpack.c.bf16 %v1439_v16, %v1437_v5 }
 0x1f1   : > { %v1527_v56 = vpop.f32.mrf.mxu2 }
 0x1f2   : > { %v1528_v20 = vadd.f32 %v1527_v56, %v4072_v30  ;;  %v1616_v21 = vpop.f32.mrf.mxu3  ;;  %v1352_v22 = vpop.f32.mrf.mxu0 }
 0x1f3   : > { %v1353_v7 = vadd.f32 %v1352_v22, %v4063_v17  ;;  %v1441_v9 = vpop.f32.mrf.mxu1 }
 0x1f4   : > { %v1617_v15 = vadd.f32 %v1616_v21, %v1528_v20 }
 0x1f5   : > { %v1442_v2 = vadd.f32 %v1441_v9, %v1353_v7  ;;  %1391 = vmatmul.bf16.gmra.mxu0 %v4000_v51 }
 0x1f6   : > { %v4168_v60 = vpack.c.bf16 %v1617_v15, %v1615_v14  ;;  %1480 = vmatmul.bf16.gmra.mxu1 %v4008_v18  ;;  %1569 = vmatmul.bf16.gmra.mxu2 %v4000_v51 }
 0x1f7   : > { %1658 = vmatmul.bf16.gmra.mxu3 %v4008_v18 }
 0x1f9   : > { %v1530_v51 = vpop.f32.mrf.mxu2 }
 0x1fa   : > { %v1531_v18 = vadd.f32 %v1530_v51, %v4072_v30  ;;  %v1619_v32 = vpop.f32.mrf.mxu3  ;;  %v1354_v43 = vpop.f32.mrf.mxu0 }
 0x1fb   : > { %v1355_v33 = vadd.f32 %v1354_v43, %v4063_v17  ;;  %v1443_v57 = vpop.f32.mrf.mxu1 }
 0x1fc   : > { %v1620_v36 = vadd.f32 %v1619_v32, %v1531_v18 }
 0x1fd   : > { %v1444_v49 = vadd.f32 %v1443_v57, %v1355_v33 }
 0x1ff   : > { %v4187_v37 = vpack.c.bf16 %v1444_v49, %v1442_v2 }
 0x201   : > { %v1532_v48 = vpop.f32.mrf.mxu2 }
 0x202   : > { %v1533_v54 = vadd.f32 %v1532_v48, %v4072_v30  ;;  %v1621_v55 = vpop.f32.mrf.mxu3  ;;  %v1357_v59 = vpop.f32.mrf.mxu0 }
 0x203   : > { %v1358_v62 = vadd.f32 %v1357_v59, %v4063_v17  ;;  %v1446_v63 = vpop.f32.mrf.mxu1 }
 0x204   : > { %v1622_v1 = vadd.f32 %v1621_v55, %v1533_v54 }
 0x205   : > { %v1447_v35 = vadd.f32 %v1446_v63, %v1358_v62  ;;  %1396 = vmatmul.bf16.gmra.mxu0 %v4012_v13 }
 0x206   : > { %v4204_v3 = vpack.c.bf16 %v1622_v1, %v1620_v36  ;;  %1485 = vmatmul.bf16.gmra.mxu1 %v4032_v29  ;;  %1574 = vmatmul.bf16.gmra.mxu2 %v4012_v13 }
 0x207   : > { %1663 = vmatmul.bf16.gmra.mxu3 %v4032_v29 }
 0x209   : > { %v1535_v4 = vpop.f32.mrf.mxu2 }
 0x20a   : > { %v1536_v5 = vadd.f32 %v1535_v4, %v4072_v30  ;;  %v1624_v45 = vpop.f32.mrf.mxu3  ;;  %v1359_v10 = vpop.f32.mrf.mxu0 }
 0x20b   : > { %v1360_v0 = vadd.f32 %v1359_v10, %v4063_v17  ;;  %v1448_v12 = vpop.f32.mrf.mxu1 }
 0x20c   : > { %v1625_v42 = vadd.f32 %v1624_v45, %v1536_v5 }
 0x20d   : > { %v1449_v61 = vadd.f32 %v1448_v12, %v1360_v0 }
 0x20f   : > { %v4211_v14 = vpack.c.bf16 %v1449_v61, %v1447_v35 }
 0x211   : > { %v1537_v16 = vpop.f32.mrf.mxu2 }
 0x212   : > { %v1538_v56 = vadd.f32 %v1537_v16, %v4072_v30  ;;  %v1626_v20 = vpop.f32.mrf.mxu3  ;;  %v1362_v21 = vpop.f32.mrf.mxu0 }
 0x213   : > { %v1363_v13 = vadd.f32 %v1362_v21, %v4063_v17  ;;  %v1451_v29 = vpop.f32.mrf.mxu1 }
 0x214   : > { %v1627_v22 = vadd.f32 %v1626_v20, %v1538_v56 }
 0x215   : > { %v1452_v7 = vadd.f32 %v1451_v29, %v1363_v13  ;;  %1401 = vmatmul.bf16.gmra.mxu0 %v4048_v58 }
 0x216   : > { %v4216_v9 = vpack.c.bf16 %v1627_v22, %v1625_v42  ;;  %1490 = vmatmul.bf16.gmra.mxu1 %v4056_v28  ;;  %1579 = vmatmul.bf16.gmra.mxu2 %v4048_v58 }
 0x217   : > { %1668 = vmatmul.bf16.gmra.mxu3 %v4056_v28 }
 0x219   : > { %v1540_v15 = vpop.f32.mrf.mxu2 }
 0x21a   : > { %v1541_v2 = vadd.f32 %v1540_v15, %v4072_v30  ;;  %v1629_v23 = vpop.f32.mrf.mxu3  ;;  %v1364_v25 = vpop.f32.mrf.mxu0 }
 0x21b   : > { %v1365_v27 = vadd.f32 %v1364_v25, %v4063_v17  ;;  %v1453_v41 = vpop.f32.mrf.mxu1 }
 0x21c   : > { %v1630_v24 = vadd.f32 %v1629_v23, %v1541_v2 }
 0x21d   : > { %v1454_v51 = vadd.f32 %v1453_v41, %v1365_v27 }
 0x21f   : > { %v4223_v31 = vpack.c.bf16 %v1454_v51, %v1452_v7 }
 0x221   : > { %v1542_v18 = vpop.f32.mrf.mxu2 }
 0x222   : > { %v1543_v32 = vadd.f32 %v1542_v18, %v4072_v30  ;;  %v1631_v43 = vpop.f32.mrf.mxu3  ;;  %v1367_v33 = vpop.f32.mrf.mxu0 }
 0x223   : > { %v1368_v58 = vadd.f32 %v1367_v33, %v4063_v17  ;;  %v1456_v28 = vpop.f32.mrf.mxu1 }
 0x224   : > { %v1632_v57 = vadd.f32 %v1631_v43, %v1543_v32 }
 0x225   : > { %v1457_v36 = vadd.f32 %v1456_v28, %v1368_v58  ;;  %1406 = vmatmul.bf16.gmra.mxu0 %v4065_v19 }
 0x226   : > { %v4228_v49 = vpack.c.bf16 %v1632_v57, %v1630_v24  ;;  %1495 = vmatmul.bf16.gmra.mxu1 %v4087_v34  ;;  %1584 = vmatmul.bf16.gmra.mxu2 %v4065_v19 }
 0x227   : > { %1673 = vmatmul.bf16.gmra.mxu3 %v4087_v34 }
 0x229   : > { %v1545_v38 = vpop.f32.mrf.mxu2 }
 0x22a   : > { %v1546_v39 = vadd.f32 %v1545_v38, %v4072_v30  ;;  %v1634_v40 = vpop.f32.mrf.mxu3  ;;  %v1369_v46 = vpop.f32.mrf.mxu0 }
 0x22b   : > { %v1370_v47 = vadd.f32 %v1369_v46, %v4063_v17  ;;  %v1458_v48 = vpop.f32.mrf.mxu1 }
 0x22c   : > { %v1635_v53 = vadd.f32 %v1634_v40, %v1546_v39 }
 0x22d   : > { %v1459_v54 = vadd.f32 %v1458_v48, %v1370_v47 }
 0x22f   : > { %v4235_v55 = vpack.c.bf16 %v1459_v54, %v1457_v36 }
 0x231   : > { %v1547_v59 = vpop.f32.mrf.mxu2 }
 0x232   : > { %v1548_v62 = vadd.f32 %v1547_v59, %v4072_v30  ;;  %v1636_v63 = vpop.f32.mrf.mxu3  ;;  %v1372_v1 = vpop.f32.mrf.mxu0 }
 0x233   : > { %v1373_v19 = vadd.f32 %v1372_v1, %v4063_v17  ;;  %v1461_v34 = vpop.f32.mrf.mxu1 }
 0x234   : > { %v1637_v35 = vadd.f32 %v1636_v63, %v1548_v62 }
 0x235   : > { %v1462_v4 = vadd.f32 %v1461_v34, %v1373_v19  ;;  %1917 = vmatmul.bf16.vlgmr.msra.gmra.mxu0 %v4091_v52 }
 0x236   : > { %v4240_v5 = vpack.c.bf16 %v1637_v35, %v1635_v53  ;;  %2006 = vmatmul.bf16.vlgmr.msra.gmra.mxu1 %v4108_v11  ;;  %2095 = vmatmul.bf16.vlgmr.msra.gmra.mxu2 %v4091_v52 }
 0x237   : > { %2184 = vmatmul.bf16.vlgmr.msra.gmra.mxu3 %v4108_v11 }
 0x239   : > { %v1550_v45 = vpop.f32.mrf.mxu2 }
 0x23a   : > { %v1551_v10 = vadd.f32 %v1550_v45, %v4072_v30  ;;  %v1639_v0 = vpop.f32.mrf.mxu3  ;;  %v1374_v12 = vpop.f32.mrf.mxu0 }
 0x23b   : > { %v1375_v42 = vadd.f32 %v1374_v12, %v4063_v17  ;;  %v1463_v61 = vpop.f32.mrf.mxu1 }
 0x23c   : > { %v1640_v16 = vadd.f32 %v1639_v0, %v1551_v10 }
 0x23d   : > { %v1464_v56 = vadd.f32 %v1463_v61, %v1375_v42 }
 0x23f   : > { %v4247_v20 = vpack.c.bf16 %v1464_v56, %v1462_v4 }
 0x241   : > { %v1552_v21 = vpop.f32.mrf.mxu2 }
 0x242   : > { %v1553_v13 = vadd.f32 %v1552_v21, %v4072_v30  ;;  %v1641_v29 = vpop.f32.mrf.mxu3  ;;  %v1377_v22 = vpop.f32.mrf.mxu0 }
 0x243   : > { %v1378_v52 = vadd.f32 %v1377_v22, %v4063_v17  ;;  %v1466_v11 = vpop.f32.mrf.mxu1 }
 0x244   : > { %v1642_v7 = vadd.f32 %v1641_v29, %v1553_v13 }
 0x245   : > { %v1467_v15 = vadd.f32 %v1466_v11, %v1378_v52  ;;  %1922 = vmatmul.bf16.gmra.mxu0 %v4115_v50 }
 0x246   : > { %v4252_v2 = vpack.c.bf16 %v1642_v7, %v1640_v16  ;;  %2011 = vmatmul.bf16.gmra.mxu1 %v4120_v26  ;;  %2100 = vmatmul.bf16.gmra.mxu2 %v4115_v50 }
 0x247   : > { %2189 = vmatmul.bf16.gmra.mxu3 %v4120_v26 }
 0x249   : > { %v1555_v23 = vpop.f32.mrf.mxu2 }
 0x24a   : > { %v1556_v25 = vadd.f32 %v1555_v23, %v4072_v30  ;;  %v1644_v27 = vpop.f32.mrf.mxu3  ;;  %v1379_v41 = vpop.f32.mrf.mxu0 }
 0x24b   : > { %v1380_v24 = vadd.f32 %v1379_v41, %v4063_v17  ;;  %v1468_v51 = vpop.f32.mrf.mxu1 }
 0x24c   : > { %v1645_v18 = vadd.f32 %v1644_v27, %v1556_v25 }
 0x24d   : > { %v1469_v32 = vadd.f32 %v1468_v51, %v1380_v24 }
 0x24f   : > { %v4259_v43 = vpack.c.bf16 %v1469_v32, %v1467_v15 }
 0x251   : > { %v1557_v33 = vpop.f32.mrf.mxu2 }
 0x252   : > { %v1558_v58 = vadd.f32 %v1557_v33, %v4072_v30  ;;  %v1646_v28 = vpop.f32.mrf.mxu3  ;;  %v1382_v57 = vpop.f32.mrf.mxu0 }
 0x253   : > { %v1383_v50 = vadd.f32 %v1382_v57, %v4063_v17  ;;  %v1471_v26 = vpop.f32.mrf.mxu1 }
 0x254   : > { %v1647_v36 = vadd.f32 %v1646_v28, %v1558_v58 }
 0x255   : > { %v1472_v38 = vadd.f32 %v1471_v26, %v1383_v50  ;;  %1927 = vmatmul.bf16.gmra.mxu0 %v4139_v44 }
 0x256   : > { %v4264_v39 = vpack.c.bf16 %v1647_v36, %v1645_v18  ;;  %2016 = vmatmul.bf16.gmra.mxu1 %v4156_v6  ;;  %2105 = vmatmul.bf16.gmra.mxu2 %v4139_v44 }
 0x257   : > { %2194 = vmatmul.bf16.gmra.mxu3 %v4156_v6 }
 0x259   : > { %v1560_v40 = vpop.f32.mrf.mxu2 }
 0x25a   : > { %v1561_v46 = vadd.f32 %v1560_v40, %v4072_v30  ;;  %v1649_v47 = vpop.f32.mrf.mxu3  ;;  %v1384_v48 = vpop.f32.mrf.mxu0 }
 0x25b   : > { %v1385_v53 = vadd.f32 %v1384_v48, %v4063_v17  ;;  %v1473_v54 = vpop.f32.mrf.mxu1 }
 0x25c   : > { %v1650_v59 = vadd.f32 %v1649_v47, %v1561_v46 }
 0x25d   : > { %v1474_v62 = vadd.f32 %v1473_v54, %v1385_v53 }
 0x25f   : > { %v4271_v63 = vpack.c.bf16 %v1474_v62, %v1472_v38 }
 0x261   : > { %v1562_v1 = vpop.f32.mrf.mxu2 }
 0x262   : > { %v1563_v19 = vadd.f32 %v1562_v1, %v4072_v30  ;;  %v1651_v34 = vpop.f32.mrf.mxu3  ;;  %v1387_v35 = vpop.f32.mrf.mxu0 }
 0x263   : > { %v1388_v44 = vadd.f32 %v1387_v35, %v4063_v17  ;;  %v1476_v6 = vpop.f32.mrf.mxu1 }
 0x264   : > { %v1652_v4 = vadd.f32 %v1651_v34, %v1563_v19 }
 0x265   : > { %v1477_v45 = vadd.f32 %v1476_v6, %v1388_v44  ;;  %1932 = vmatmul.bf16.gmra.mxu0 %v4163_v8 }
 0x266   : > { %v4276_v10 = vpack.c.bf16 %v1652_v4, %v1650_v59  ;;  %2021 = vmatmul.bf16.gmra.mxu1 %v4168_v60  ;;  %2110 = vmatmul.bf16.gmra.mxu2 %v4163_v8 }
 0x267   : > { %2199 = vmatmul.bf16.gmra.mxu3 %v4168_v60 }
 0x269   : > { %v1565_v0 = vpop.f32.mrf.mxu2 }
 0x26a   : > { %v1566_v12 = vadd.f32 %v1565_v0, %v4072_v30  ;;  %v1654_v42 = vpop.f32.mrf.mxu3  ;;  %v1389_v61 = vpop.f32.mrf.mxu0 }
 0x26b   : > { %v1390_v16 = vadd.f32 %v1389_v61, %v4063_v17  ;;  %v1478_v56 = vpop.f32.mrf.mxu1 }
 0x26c   : > { %v1655_v21 = vadd.f32 %v1654_v42, %v1566_v12 }
 0x26d   : > { %v1479_v13 = vadd.f32 %v1478_v56, %v1390_v16 }
 0x26f   : > { %v4283_v29 = vpack.c.bf16 %v1479_v13, %v1477_v45 }
 0x271   : > { %v1567_v22 = vpop.f32.mrf.mxu2 }
 0x272   : > { %v1568_v52 = vadd.f32 %v1567_v22, %v4072_v30  ;;  %v1656_v11 = vpop.f32.mrf.mxu3  ;;  %v1392_v7 = vpop.f32.mrf.mxu0 }
 0x273   : > { %v1393_v8 = vadd.f32 %v1392_v7, %v4063_v17  ;;  %v1481_v60 = vpop.f32.mrf.mxu1 }
 0x274   : > { %v1657_v15 = vadd.f32 %v1656_v11, %v1568_v52 }
 0x275   : > { %v1482_v23 = vadd.f32 %v1481_v60, %v1393_v8  ;;  %1937 = vmatmul.bf16.gmra.mxu0 %v4187_v37 }
 0x276   : > { %v4288_v25 = vpack.c.bf16 %v1657_v15, %v1655_v21  ;;  %2026 = vmatmul.bf16.gmra.mxu1 %v4204_v3  ;;  %2115 = vmatmul.bf16.gmra.mxu2 %v4187_v37 }
 0x277   : > { %2204 = vmatmul.bf16.gmra.mxu3 %v4204_v3 }
 0x279   : > { %v1570_v27 = vpop.f32.mrf.mxu2 }
 0x27a   : > { %v1571_v41 = vadd.f32 %v1570_v27, %v4072_v30  ;;  %v1659_v24 = vpop.f32.mrf.mxu3  ;;  %v1394_v51 = vpop.f32.mrf.mxu0 }
 0x27b   : > { %v1395_v18 = vadd.f32 %v1394_v51, %v4063_v17  ;;  %v1483_v32 = vpop.f32.mrf.mxu1 }
 0x27c   : > { %v1660_v33 = vadd.f32 %v1659_v24, %v1571_v41 }
 0x27d   : > { %v1484_v58 = vadd.f32 %v1483_v32, %v1395_v18 }
 0x27f   : > { %v4295_v28 = vpack.c.bf16 %v1484_v58, %v1482_v23 }
 0x281   : > { %v1572_v57 = vpop.f32.mrf.mxu2 }
 0x282   : > { %v1573_v50 = vadd.f32 %v1572_v57, %v4072_v30  ;;  %v1661_v26 = vpop.f32.mrf.mxu3  ;;  %v1397_v36 = vpop.f32.mrf.mxu0 }
 0x283   : > { %v1398_v37 = vadd.f32 %v1397_v36, %v4063_v17  ;;  %v1486_v3 = vpop.f32.mrf.mxu1 }
 0x284   : > { %v1662_v38 = vadd.f32 %v1661_v26, %v1573_v50  ;;  %v1743_v50 = vld [vmem:[%s4548_s6] sm:$0x3] }
 0x285   : > { %v1487_v40 = vadd.f32 %v1486_v3, %v1398_v37  ;;  %1942 = vmatmul.bf16.gmra.mxu0 %v4211_v14 }
 0x286   : > { %v4300_v46 = vpack.c.bf16 %v1662_v38, %v1660_v33  ;;  %2031 = vmatmul.bf16.gmra.mxu1 %v4216_v9  ;;  %2120 = vmatmul.bf16.gmra.mxu2 %v4211_v14 }
 0x287   : > { %2209 = vmatmul.bf16.gmra.mxu3 %v4216_v9 }
 0x289   : > { %v1575_v47 = vpop.f32.mrf.mxu2 }
 0x28a   : > { %v1576_v48 = vadd.f32 %v1575_v47, %v4072_v30  ;;  %v1664_v53 = vpop.f32.mrf.mxu3  ;;  %v1399_v54 = vpop.f32.mrf.mxu0 }
 0x28b   : > { %v1400_v59 = vadd.f32 %v1399_v54, %v4063_v17  ;;  %v1488_v62 = vpop.f32.mrf.mxu1  ;;  %v4348_v54 = vperm.slane %v1743_v50, 1 }
 0x28c   : > { %v1665_v1 = vadd.f32 %v1664_v53, %v1576_v48 }
 0x28d   : > { %v1489_v19 = vadd.f32 %v1488_v62, %v1400_v59 }
 0x28f   : > { %v4307_v34 = vpack.c.bf16 %v1489_v19, %v1487_v40 }
 0x291   : > { %v1577_v35 = vpop.f32.mrf.mxu2 }
 0x292   : > { %v1578_v44 = vadd.f32 %v1577_v35, %v4072_v30  ;;  %v1666_v6 = vpop.f32.mrf.mxu3  ;;  %v1402_v4 = vpop.f32.mrf.mxu0 }
 0x293   : > { %v1403_v14 = vadd.f32 %v1402_v4, %v4063_v17  ;;  %v1491_v9 = vpop.f32.mrf.mxu1 }
 0x294   : > { %v1667_v45 = vadd.f32 %v1666_v6, %v1578_v44 }
 0x295   : > { %v1492_v0 = vadd.f32 %v1491_v9, %v1403_v14  ;;  %1947 = vmatmul.bf16.gmra.mxu0 %v4223_v31 }
 0x296   : > { %v4312_v12 = vpack.c.bf16 %v1667_v45, %v1665_v1  ;;  %2036 = vmatmul.bf16.gmra.mxu1 %v4228_v49  ;;  %2125 = vmatmul.bf16.gmra.mxu2 %v4223_v31 }
 0x297   : > { %2214 = vmatmul.bf16.gmra.mxu3 %v4228_v49 }
 0x299   : > { %v1580_v42 = vpop.f32.mrf.mxu2 }
 0x29a   : > { %v1581_v61 = vadd.f32 %v1580_v42, %v4072_v30  ;;  %v1669_v16 = vpop.f32.mrf.mxu3  ;;  %v1404_v56 = vpop.f32.mrf.mxu0 }
 0x29b   : > { %v1405_v21 = vadd.f32 %v1404_v56, %v4063_v17  ;;  %v1493_v13 = vpop.f32.mrf.mxu1 }
 0x29c   : > { %v1670_v22 = vadd.f32 %v1669_v16, %v1581_v61 }
 0x29d   : > { %v1494_v52 = vadd.f32 %v1493_v13, %v1405_v21 }
 0x29f   : > { %v4319_v11 = vpack.c.bf16 %v1494_v52, %v1492_v0 }
 0x2a1   : > { %v1582_v7 = vpop.f32.mrf.mxu2 }
 0x2a2   : > { %v1583_v8 = vadd.f32 %v1582_v7, %v4072_v30  ;;  %v1671_v60 = vpop.f32.mrf.mxu3  ;;  %v1407_v15 = vpop.f32.mrf.mxu0 }
 0x2a3   : > { %v1408_v31 = vadd.f32 %v1407_v15, %v4063_v17  ;;  %v1496_v49 = vpop.f32.mrf.mxu1 }
 0x2a4   : > { %v1672_v23 = vadd.f32 %v1671_v60, %v1583_v8 }
 0x2a5   : > { %v1497_v27 = vadd.f32 %v1496_v49, %v1408_v31  ;;  %1952 = vmatmul.bf16.gmra.mxu0 %v4235_v55 }
 0x2a6   : > { %v4324_v41 = vpack.c.bf16 %v1672_v23, %v1670_v22  ;;  %2041 = vmatmul.bf16.gmra.mxu1 %v4240_v5  ;;  %2130 = vmatmul.bf16.gmra.mxu2 %v4235_v55  ;;  %v4336_v55 = vperm.slane %v1743_v50, 0 }
 0x2a7   : > { %2219 = vmatmul.bf16.gmra.mxu3 %v4240_v5 }
 0x2a9   : > { %v1585_v24 = vpop.f32.mrf.mxu2 }
 0x2aa   : > { %v1586_v51 = vadd.f32 %v1585_v24, %v4072_v30  ;;  %v1674_v18 = vpop.f32.mrf.mxu3  ;;  %v1409_v32 = vpop.f32.mrf.mxu0 }
 0x2ab   : > { %v1410_v33 = vadd.f32 %v1409_v32, %v4063_v17  ;;  %v1498_v58 = vpop.f32.mrf.mxu1 }
 0x2ac   : > { %v1675_v57 = vadd.f32 %v1674_v18, %v1586_v51 }
 0x2ad   : > { %v1499_v26 = vadd.f32 %v1498_v58, %v1410_v33 }
 0x2af   : > { %v4334_v36 = vpack.c.bf16 %v1499_v26, %v1497_v27 }
 0x2b1   : > { %v1587_v5 = vpop.f32.mrf.mxu2 }
 0x2b2   : > { %v1588_v37 = vadd.f32 %v1587_v5, %v4072_v30  ;;  %v1676_v3 = vpop.f32.mrf.mxu3  ;;  %v1918_v38 = vpop.f32.mrf.mxu0 }
 0x2b3   : > { %v1919_v40 = vadd.f32 %v1918_v38, %v4336_v55  ;;  %v2007_v17 = vpop.f32.mrf.mxu1 }
 0x2b4   : > { %v1677_v47 = vadd.f32 %v1676_v3, %v1588_v37 }
 0x2b5   : > { %v2008_v48 = vadd.f32 %v2007_v17, %v1919_v40  ;;  %1957 = vmatmul.bf16.gmra.mxu0 %v4247_v20 }
 0x2b6   : > { %v4344_v53 = vpack.c.bf16 %v1677_v47, %v1675_v57  ;;  %2046 = vmatmul.bf16.gmra.mxu1 %v4252_v2  ;;  %2135 = vmatmul.bf16.gmra.mxu2 %v4247_v20 }
 0x2b7   : > { %v2265_v30 = vmax.f32 %v2008_v48, 0.0  ;;  %2224 = vmatmul.bf16.gmra.mxu3 %v4252_v2 }
 0x2b9   : > { %2329 = vst [vmem:[%s4351_s15] sm:$0xff] %v2265_v30  ;;  %v2096_v59 = vpop.f32.mrf.mxu2 }
 0x2ba   : > { %v2097_v62 = vadd.f32 %v2096_v59, %v4348_v54  ;;  %v2185_v1 = vpop.f32.mrf.mxu3  ;;  %v1920_v19 = vpop.f32.mrf.mxu0 }
 0x2bb   : > { %v1921_v35 = vadd.f32 %v1920_v19, %v4336_v55  ;;  %v2009_v44 = vpop.f32.mrf.mxu1 }
 0x2bc   : > { %v2186_v20 = vadd.f32 %v2185_v1, %v2097_v62 }
 0x2bd   : > { %v2010_v6 = vadd.f32 %v2009_v44, %v1921_v35 }
 0x2be   : > { %v2266_v4 = vmax.f32 %v2186_v20, 0.0 }
 0x2bf   : > { %v2267_v14 = vmax.f32 %v2010_v6, 0.0 }
 0x2c0   : > { %2330 = vst [vmem:[%s4351_s15 + $0x8] sm:$0xff] %v2266_v4 }
 0x2c1   : > { %2331 = vst [vmem:[%s4351_s15 + $0x10] sm:$0xff] %v2267_v14  ;;  %v2098_v2 = vpop.f32.mrf.mxu2 }
 0x2c2   : > { %v2099_v9 = vadd.f32 %v2098_v2, %v4348_v54  ;;  %v2187_v45 = vpop.f32.mrf.mxu3  ;;  %v1923_v0 = vpop.f32.mrf.mxu0 }
 0x2c3   : > { %v1924_v42 = vadd.f32 %v1923_v0, %v4336_v55  ;;  %v2012_v61 = vpop.f32.mrf.mxu1 }
 0x2c4   : > { %v2188_v16 = vadd.f32 %v2187_v45, %v2099_v9 }
 0x2c5   : > { %v2013_v56 = vadd.f32 %v2012_v61, %v1924_v42  ;;  %1962 = vmatmul.bf16.gmra.mxu0 %v4259_v43 }
 0x2c6   : > { %v2268_v21 = vmax.f32 %v2188_v16, 0.0  ;;  %2051 = vmatmul.bf16.gmra.mxu1 %v4264_v39  ;;  %2140 = vmatmul.bf16.gmra.mxu2 %v4259_v43 }
 0x2c7   : > { %v2269_v13 = vmax.f32 %v2013_v56, 0.0  ;;  %2229 = vmatmul.bf16.gmra.mxu3 %v4264_v39 }
 0x2c8   : > { %2332 = vst [vmem:[%s4351_s15 + $0x18] sm:$0xff] %v2268_v21 }
 0x2c9   : > { %2333 = vst [vmem:[%s4351_s15 + $0x20] sm:$0xff] %v2269_v13  ;;  %v2101_v22 = vpop.f32.mrf.mxu2 }
 0x2ca   : > { %v2102_v52 = vadd.f32 %v2101_v22, %v4348_v54  ;;  %v2190_v7 = vpop.f32.mrf.mxu3  ;;  %v1925_v8 = vpop.f32.mrf.mxu0 }
 0x2cb   : > { %v1926_v60 = vadd.f32 %v1925_v8, %v4336_v55  ;;  %v2014_v15 = vpop.f32.mrf.mxu1 }
 0x2cc   : > { %v2191_v31 = vadd.f32 %v2190_v7, %v2102_v52 }
 0x2cd   : > { %v2015_v49 = vadd.f32 %v2014_v15, %v1926_v60 }
 0x2ce   : > { %v2270_v23 = vmax.f32 %v2191_v31, 0.0 }
 0x2cf   : > { %v2271_v27 = vmax.f32 %v2015_v49, 0.0 }
 0x2d0   : > { %2334 = vst [vmem:[%s4351_s15 + $0x28] sm:$0xff] %v2270_v23 }
 0x2d1   : > { %2335 = vst [vmem:[%s4351_s15 + $0x30] sm:$0xff] %v2271_v27  ;;  %v2103_v43 = vpop.f32.mrf.mxu2 }
 0x2d2   : > { %v2104_v39 = vadd.f32 %v2103_v43, %v4348_v54  ;;  %v2192_v24 = vpop.f32.mrf.mxu3  ;;  %v1928_v51 = vpop.f32.mrf.mxu0 }
 0x2d3   : > { %v1929_v18 = vadd.f32 %v1928_v51, %v4336_v55  ;;  %v2017_v32 = vpop.f32.mrf.mxu1 }
 0x2d4   : > { %v2193_v33 = vadd.f32 %v2192_v24, %v2104_v39 }
 0x2d5   : > { %v2018_v58 = vadd.f32 %v2017_v32, %v1929_v18  ;;  %1967 = vmatmul.bf16.gmra.mxu0 %v4271_v63 }
 0x2d6   : > { %v2272_v57 = vmax.f32 %v2193_v33, 0.0  ;;  %2056 = vmatmul.bf16.gmra.mxu1 %v4276_v10  ;;  %2145 = vmatmul.bf16.gmra.mxu2 %v4271_v63 }
 0x2d7   : > { %v2273_v50 = vmax.f32 %v2018_v58, 0.0  ;;  %2234 = vmatmul.bf16.gmra.mxu3 %v4276_v10 }
 0x2d8   : > { %2336 = vst [vmem:[%s4351_s15 + $0x38] sm:$0xff] %v2272_v57 }
 0x2d9   : > { %2337 = vst [vmem:[%s4351_s15 + $0x40] sm:$0xff] %v2273_v50  ;;  %v2106_v26 = vpop.f32.mrf.mxu2 }
 0x2da   : > { %v2107_v5 = vadd.f32 %v2106_v26, %v4348_v54  ;;  %v2195_v37 = vpop.f32.mrf.mxu3  ;;  %v1930_v3 = vpop.f32.mrf.mxu0 }
 0x2db   : > { %v1931_v38 = vadd.f32 %v1930_v3, %v4336_v55  ;;  %v2019_v40 = vpop.f32.mrf.mxu1 }
 0x2dc   : > { %v2196_v17 = vadd.f32 %v2195_v37, %v2107_v5 }
 0x2dd   : > { %v2020_v47 = vadd.f32 %v2019_v40, %v1931_v38 }
 0x2de   : > { %v2274_v48 = vmax.f32 %v2196_v17, 0.0 }
 0x2df   : > { %v2275_v30 = vmax.f32 %v2020_v47, 0.0 }
 0x2e0   : > { %2338 = vst [vmem:[%s4351_s15 + $0x48] sm:$0xff] %v2274_v48 }
 0x2e1   : > { %2339 = vst [vmem:[%s4351_s15 + $0x50] sm:$0xff] %v2275_v30  ;;  %v2108_v63 = vpop.f32.mrf.mxu2 }
 0x2e2   : > { %v2109_v10 = vadd.f32 %v2108_v63, %v4348_v54  ;;  %v2197_v59 = vpop.f32.mrf.mxu3  ;;  %v1933_v62 = vpop.f32.mrf.mxu0 }
 0x2e3   : > { %v1934_v1 = vadd.f32 %v1933_v62, %v4336_v55  ;;  %v2022_v19 = vpop.f32.mrf.mxu1 }
 0x2e4   : > { %v2198_v35 = vadd.f32 %v2197_v59, %v2109_v10 }
 0x2e5   : > { %v2023_v44 = vadd.f32 %v2022_v19, %v1934_v1  ;;  %1972 = vmatmul.bf16.gmra.mxu0 %v4283_v29 }
 0x2e6   : > { %v2276_v20 = vmax.f32 %v2198_v35, 0.0  ;;  %2061 = vmatmul.bf16.gmra.mxu1 %v4288_v25  ;;  %2150 = vmatmul.bf16.gmra.mxu2 %v4283_v29 }
 0x2e7   : > { %v2277_v6 = vmax.f32 %v2023_v44, 0.0  ;;  %2239 = vmatmul.bf16.gmra.mxu3 %v4288_v25 }
 0x2e8   : > { %2340 = vst [vmem:[%s4351_s15 + $0x58] sm:$0xff] %v2276_v20 }
 0x2e9   : > { %2341 = vst [vmem:[%s4351_s15 + $0x60] sm:$0xff] %v2277_v6  ;;  %v2111_v4 = vpop.f32.mrf.mxu2 }
 0x2ea   : > { %v2112_v14 = vadd.f32 %v2111_v4, %v4348_v54  ;;  %v2200_v2 = vpop.f32.mrf.mxu3  ;;  %v1935_v9 = vpop.f32.mrf.mxu0 }
 0x2eb   : > { %v1936_v45 = vadd.f32 %v1935_v9, %v4336_v55  ;;  %v2024_v0 = vpop.f32.mrf.mxu1 }
 0x2ec   : > { %v2201_v42 = vadd.f32 %v2200_v2, %v2112_v14 }
 0x2ed   : > { %v2025_v61 = vadd.f32 %v2024_v0, %v1936_v45 }
 0x2ee   : > { %v2278_v16 = vmax.f32 %v2201_v42, 0.0 }
 0x2ef   : > { %v2279_v56 = vmax.f32 %v2025_v61, 0.0 }
 0x2f0   : > { %2342 = vst [vmem:[%s4351_s15 + $0x68] sm:$0xff] %v2278_v16 }
 0x2f1   : > { %2343 = vst [vmem:[%s4351_s15 + $0x70] sm:$0xff] %v2279_v56  ;;  %v2113_v29 = vpop.f32.mrf.mxu2 }
 0x2f2   : > { %v2114_v25 = vadd.f32 %v2113_v29, %v4348_v54  ;;  %v2202_v21 = vpop.f32.mrf.mxu3  ;;  %v1938_v13 = vpop.f32.mrf.mxu0 }
 0x2f3   : > { %v1939_v22 = vadd.f32 %v1938_v13, %v4336_v55  ;;  %v2027_v52 = vpop.f32.mrf.mxu1 }
 0x2f4   : > { %v2203_v7 = vadd.f32 %v2202_v21, %v2114_v25 }
 0x2f5   : > { %v2028_v8 = vadd.f32 %v2027_v52, %v1939_v22  ;;  %1977 = vmatmul.bf16.gmra.mxu0 %v4295_v28 }
 0x2f6   : > { %v2280_v60 = vmax.f32 %v2203_v7, 0.0  ;;  %2066 = vmatmul.bf16.gmra.mxu1 %v4300_v46  ;;  %2155 = vmatmul.bf16.gmra.mxu2 %v4295_v28 }
 0x2f7   : > { %v2281_v15 = vmax.f32 %v2028_v8, 0.0  ;;  %2244 = vmatmul.bf16.gmra.mxu3 %v4300_v46 }
 0x2f8   : > { %2344 = vst [vmem:[%s4351_s15 + $0x78] sm:$0xff] %v2280_v60 }
 0x2f9   : > { %2345 = vst [vmem:[%s4351_s15 + $0x80] sm:$0xff] %v2281_v15  ;;  %v2116_v31 = vpop.f32.mrf.mxu2 }
 0x2fa   : > { %v2117_v49 = vadd.f32 %v2116_v31, %v4348_v54  ;;  %v2205_v23 = vpop.f32.mrf.mxu3  ;;  %v1940_v27 = vpop.f32.mrf.mxu0 }
 0x2fb   : > { %v1941_v43 = vadd.f32 %v1940_v27, %v4336_v55  ;;  %v2029_v39 = vpop.f32.mrf.mxu1 }
 0x2fc   : > { %v2206_v24 = vadd.f32 %v2205_v23, %v2117_v49 }
 0x2fd   : > { %v2030_v51 = vadd.f32 %v2029_v39, %v1941_v43 }
 0x2fe   : > { %v2282_v18 = vmax.f32 %v2206_v24, 0.0 }
 0x2ff   : > { %v2283_v32 = vmax.f32 %v2030_v51, 0.0 }
 0x300   : > { %2346 = vst [vmem:[%s4351_s15 + $0x88] sm:$0xff] %v2282_v18 }
 0x301   : > { %2347 = vst [vmem:[%s4351_s15 + $0x90] sm:$0xff] %v2283_v32  ;;  %v2118_v28 = vpop.f32.mrf.mxu2 }
 0x302   : > { %v2119_v46 = vadd.f32 %v2118_v28, %v4348_v54  ;;  %v2207_v33 = vpop.f32.mrf.mxu3  ;;  %v1943_v58 = vpop.f32.mrf.mxu0 }
 0x303   : > { %v1944_v57 = vadd.f32 %v1943_v58, %v4336_v55  ;;  %v2032_v50 = vpop.f32.mrf.mxu1 }
 0x304   : > { %v2208_v26 = vadd.f32 %v2207_v33, %v2119_v46 }
 0x305   : > { %v2033_v5 = vadd.f32 %v2032_v50, %v1944_v57  ;;  %1982 = vmatmul.bf16.gmra.mxu0 %v4307_v34 }
 0x306   : > { %v2284_v37 = vmax.f32 %v2208_v26, 0.0  ;;  %2071 = vmatmul.bf16.gmra.mxu1 %v4312_v12  ;;  %2160 = vmatmul.bf16.gmra.mxu2 %v4307_v34 }
 0x307   : > { %v2285_v3 = vmax.f32 %v2033_v5, 0.0  ;;  %2249 = vmatmul.bf16.gmra.mxu3 %v4312_v12 }
 0x308   : > { %2348 = vst [vmem:[%s4351_s15 + $0x98] sm:$0xff] %v2284_v37 }
 0x309   : > { %2349 = vst [vmem:[%s4351_s15 + $0xa0] sm:$0xff] %v2285_v3  ;;  %v2121_v38 = vpop.f32.mrf.mxu2 }
 0x30a   : > { %v2122_v40 = vadd.f32 %v2121_v38, %v4348_v54  ;;  %v2210_v17 = vpop.f32.mrf.mxu3  ;;  %v1945_v47 = vpop.f32.mrf.mxu0 }
 0x30b   : > { %v1946_v48 = vadd.f32 %v1945_v47, %v4336_v55  ;;  %v2034_v30 = vpop.f32.mrf.mxu1 }
 0x30c   : > { %v2211_v63 = vadd.f32 %v2210_v17, %v2122_v40 }
 0x30d   : > { %v2035_v10 = vadd.f32 %v2034_v30, %v1946_v48 }
 0x30e   : > { %v2286_v59 = vmax.f32 %v2211_v63, 0.0 }
 0x30f   : > { %v2287_v62 = vmax.f32 %v2035_v10, 0.0 }
 0x310   : > { %2350 = vst [vmem:[%s4351_s15 + $0xa8] sm:$0xff] %v2286_v59 }
 0x311   : > { %2351 = vst [vmem:[%s4351_s15 + $0xb0] sm:$0xff] %v2287_v62  ;;  %v2123_v34 = vpop.f32.mrf.mxu2 }
 0x312   : > { %v2124_v12 = vadd.f32 %v2123_v34, %v4348_v54  ;;  %v2212_v1 = vpop.f32.mrf.mxu3  ;;  %v1948_v19 = vpop.f32.mrf.mxu0 }
 0x313   : > { %v1949_v35 = vadd.f32 %v1948_v19, %v4336_v55  ;;  %v2037_v44 = vpop.f32.mrf.mxu1 }
 0x314   : > { %v2213_v20 = vadd.f32 %v2212_v1, %v2124_v12 }
 0x315   : > { %v2038_v6 = vadd.f32 %v2037_v44, %v1949_v35  ;;  %1987 = vmatmul.bf16.gmra.mxu0 %v4319_v11 }
 0x316   : > { %v2288_v4 = vmax.f32 %v2213_v20, 0.0  ;;  %2076 = vmatmul.bf16.gmra.mxu1 %v4324_v41  ;;  %2165 = vmatmul.bf16.gmra.mxu2 %v4319_v11 }
 0x317   : > { %v2289_v14 = vmax.f32 %v2038_v6, 0.0  ;;  %2254 = vmatmul.bf16.gmra.mxu3 %v4324_v41 }
 0x318   : > { %2352 = vst [vmem:[%s4351_s15 + $0xb8] sm:$0xff] %v2288_v4 }
 0x319   : > { %2353 = vst [vmem:[%s4351_s15 + $0xc0] sm:$0xff] %v2289_v14  ;;  %v2126_v2 = vpop.f32.mrf.mxu2 }
 0x31a   : > { %v2127_v9 = vadd.f32 %v2126_v2, %v4348_v54  ;;  %v2215_v45 = vpop.f32.mrf.mxu3  ;;  %v1950_v0 = vpop.f32.mrf.mxu0 }
 0x31b   : > { %v1951_v42 = vadd.f32 %v1950_v0, %v4336_v55  ;;  %v2039_v61 = vpop.f32.mrf.mxu1 }
 0x31c   : > { %v2216_v16 = vadd.f32 %v2215_v45, %v2127_v9 }
 0x31d   : > { %v2040_v56 = vadd.f32 %v2039_v61, %v1951_v42 }
 0x31e   : > { %v2290_v29 = vmax.f32 %v2216_v16, 0.0 }
 0x31f   : > { %v2291_v25 = vmax.f32 %v2040_v56, 0.0 }
 0x320   : > { %2354 = vst [vmem:[%s4351_s15 + $0xc8] sm:$0xff] %v2290_v29 }
 0x321   : > { %2355 = vst [vmem:[%s4351_s15 + $0xd0] sm:$0xff] %v2291_v25  ;;  %v2128_v11 = vpop.f32.mrf.mxu2 }
 0x322   : > { %v2129_v41 = vadd.f32 %v2128_v11, %v4348_v54  ;;  %v2217_v21 = vpop.f32.mrf.mxu3  ;;  %v1953_v13 = vpop.f32.mrf.mxu0 }
 0x323   : > { %v1954_v22 = vadd.f32 %v1953_v13, %v4336_v55  ;;  %v2042_v52 = vpop.f32.mrf.mxu1 }
 0x324   : > { %v2218_v7 = vadd.f32 %v2217_v21, %v2129_v41 }
 0x325   : > { %v2043_v8 = vadd.f32 %v2042_v52, %v1954_v22  ;;  %1992 = vmatmul.bf16.gmra.mxu0 %v4334_v36 }
 0x326   : > { %v2292_v60 = vmax.f32 %v2218_v7, 0.0  ;;  %2081 = vmatmul.bf16.gmra.mxu1 %v4344_v53  ;;  %2170 = vmatmul.bf16.gmra.mxu2 %v4334_v36 }
 0x327   : > { %v2293_v15 = vmax.f32 %v2043_v8, 0.0  ;;  %2259 = vmatmul.bf16.gmra.mxu3 %v4344_v53 }
 0x328   : > { %2356 = vst [vmem:[%s4351_s15 + $0xd8] sm:$0xff] %v2292_v60 }
 0x329   : > { %2357 = vst [vmem:[%s4351_s15 + $0xe0] sm:$0xff] %v2293_v15  ;;  %v2131_v31 = vpop.f32.mrf.mxu2 }
 0x32a   : > { %v2132_v49 = vadd.f32 %v2131_v31, %v4348_v54  ;;  %v2220_v23 = vpop.f32.mrf.mxu3  ;;  %v1955_v27 = vpop.f32.mrf.mxu0 }
 0x32b   : > { %v1956_v43 = vadd.f32 %v1955_v27, %v4336_v55  ;;  %v2044_v39 = vpop.f32.mrf.mxu1 }
 0x32c   : > { %v2221_v24 = vadd.f32 %v2220_v23, %v2132_v49 }
 0x32d   : > { %v2045_v51 = vadd.f32 %v2044_v39, %v1956_v43 }
 0x32e   : > { %v2294_v18 = vmax.f32 %v2221_v24, 0.0 }
 0x32f   : > { %v2295_v36 = vmax.f32 %v2045_v51, 0.0 }
 0x330   : > { %2358 = vst [vmem:[%s4351_s15 + $0xe8] sm:$0xff] %v2294_v18 }
 0x331   : > { %2359 = vst [vmem:[%s4351_s15 + $0xf0] sm:$0xff] %v2295_v36  ;;  %v2133_v32 = vpop.f32.mrf.mxu2 }
 0x332   : > { %v2134_v53 = vadd.f32 %v2133_v32, %v4348_v54  ;;  %v2222_v28 = vpop.f32.mrf.mxu3  ;;  %v1958_v46 = vpop.f32.mrf.mxu0 }
 0x333   : > { %v1959_v33 = vadd.f32 %v1958_v46, %v4336_v55  ;;  %v2047_v58 = vpop.f32.mrf.mxu1 }
 0x334   : > { %v2223_v57 = vadd.f32 %v2222_v28, %v2134_v53 }
 0x335   : > { %v2048_v50 = vadd.f32 %v2047_v58, %v1959_v33 }
 0x336   : > { %v2296_v26 = vmax.f32 %v2223_v57, 0.0 }
 0x337   : > { %v2297_v5 = vmax.f32 %v2048_v50, 0.0 }
 0x338   : > { %2360 = vst [vmem:[%s4351_s15 + $0xf8] sm:$0xff] %v2296_v26 }
 0x339   : > { %2361 = vst [vmem:[%s4351_s15 + $0x100] sm:$0xff] %v2297_v5  ;;  %v2136_v37 = vpop.f32.mrf.mxu2 }
 0x33a   : > { %v2137_v3 = vadd.f32 %v2136_v37, %v4348_v54  ;;  %v2225_v38 = vpop.f32.mrf.mxu3  ;;  %v1960_v40 = vpop.f32.mrf.mxu0 }
 0x33b   : > { %v1961_v17 = vadd.f32 %v1960_v40, %v4336_v55  ;;  %v2049_v47 = vpop.f32.mrf.mxu1 }
 0x33c   : > { %v2226_v48 = vadd.f32 %v2225_v38, %v2137_v3 }
 0x33d   : > { %v2050_v30 = vadd.f32 %v2049_v47, %v1961_v17 }
 0x33e   : > { %v2298_v63 = vmax.f32 %v2226_v48, 0.0 }
 0x33f   : > { %v2299_v10 = vmax.f32 %v2050_v30, 0.0 }
 0x340   : > { %2362 = vst [vmem:[%s4351_s15 + $0x108] sm:$0xff] %v2298_v63 }
 0x341   : > { %2363 = vst [vmem:[%s4351_s15 + $0x110] sm:$0xff] %v2299_v10  ;;  %v2138_v59 = vpop.f32.mrf.mxu2 }
 0x342   : > { %v2139_v62 = vadd.f32 %v2138_v59, %v4348_v54  ;;  %v2227_v34 = vpop.f32.mrf.mxu3  ;;  %v1963_v12 = vpop.f32.mrf.mxu0 }
 0x343   : > { %v1964_v1 = vadd.f32 %v1963_v12, %v4336_v55  ;;  %v2052_v19 = vpop.f32.mrf.mxu1 }
 0x344   : > { %v2228_v35 = vadd.f32 %v2227_v34, %v2139_v62 }
 0x345   : > { %v2053_v44 = vadd.f32 %v2052_v19, %v1964_v1 }
 0x346   : > { %v2300_v20 = vmax.f32 %v2228_v35, 0.0 }
 0x347   : > { %v2301_v6 = vmax.f32 %v2053_v44, 0.0 }
 0x348   : > { %2364 = vst [vmem:[%s4351_s15 + $0x118] sm:$0xff] %v2300_v20 }
 0x349   : > { %2365 = vst [vmem:[%s4351_s15 + $0x120] sm:$0xff] %v2301_v6  ;;  %v2141_v4 = vpop.f32.mrf.mxu2 }
 0x34a   : > { %v2142_v14 = vadd.f32 %v2141_v4, %v4348_v54  ;;  %v2230_v2 = vpop.f32.mrf.mxu3  ;;  %v1965_v9 = vpop.f32.mrf.mxu0 }
 0x34b   : > { %v1966_v45 = vadd.f32 %v1965_v9, %v4336_v55  ;;  %v2054_v0 = vpop.f32.mrf.mxu1 }
 0x34c   : > { %v2231_v42 = vadd.f32 %v2230_v2, %v2142_v14 }
 0x34d   : > { %v2055_v61 = vadd.f32 %v2054_v0, %v1966_v45 }
 0x34e   : > { %v2302_v16 = vmax.f32 %v2231_v42, 0.0 }
 0x34f   : > { %v2303_v56 = vmax.f32 %v2055_v61, 0.0 }
 0x350   : > { %2366 = vst [vmem:[%s4351_s15 + $0x128] sm:$0xff] %v2302_v16 }
 0x351   : > { %2367 = vst [vmem:[%s4351_s15 + $0x130] sm:$0xff] %v2303_v56  ;;  %v2143_v29 = vpop.f32.mrf.mxu2 }
 0x352   : > { %v2144_v25 = vadd.f32 %v2143_v29, %v4348_v54  ;;  %v2232_v11 = vpop.f32.mrf.mxu3  ;;  %v1968_v41 = vpop.f32.mrf.mxu0 }
 0x353   : > { %v1969_v21 = vadd.f32 %v1968_v41, %v4336_v55  ;;  %v2057_v13 = vpop.f32.mrf.mxu1 }
 0x354   : > { %v2233_v22 = vadd.f32 %v2232_v11, %v2144_v25 }
 0x355   : > { %v2058_v52 = vadd.f32 %v2057_v13, %v1969_v21 }
 0x356   : > { %v2304_v7 = vmax.f32 %v2233_v22, 0.0 }
 0x357   : > { %v2305_v8 = vmax.f32 %v2058_v52, 0.0 }
 0x358   : > { %2368 = vst [vmem:[%s4351_s15 + $0x138] sm:$0xff] %v2304_v7 }
 0x359   : > { %2369 = vst [vmem:[%s4351_s15 + $0x140] sm:$0xff] %v2305_v8  ;;  %v2146_v60 = vpop.f32.mrf.mxu2 }
 0x35a   : > { %v2147_v15 = vadd.f32 %v2146_v60, %v4348_v54  ;;  %v2235_v31 = vpop.f32.mrf.mxu3  ;;  %v1970_v49 = vpop.f32.mrf.mxu0 }
 0x35b   : > { %v1971_v23 = vadd.f32 %v1970_v49, %v4336_v55  ;;  %v2059_v27 = vpop.f32.mrf.mxu1 }
 0x35c   : > { %v2236_v43 = vadd.f32 %v2235_v31, %v2147_v15 }
 0x35d   : > { %v2060_v39 = vadd.f32 %v2059_v27, %v1971_v23 }
 0x35e   : > { %v2306_v24 = vmax.f32 %v2236_v43, 0.0 }
 0x35f   : > { %v2307_v51 = vmax.f32 %v2060_v39, 0.0 }
 0x360   : > { %2370 = vst [vmem:[%s4351_s15 + $0x148] sm:$0xff] %v2306_v24 }
 0x361   : > { %2371 = vst [vmem:[%s4351_s15 + $0x150] sm:$0xff] %v2307_v51  ;;  %v2148_v18 = vpop.f32.mrf.mxu2 }
 0x362   : > { %v2149_v36 = vadd.f32 %v2148_v18, %v4348_v54  ;;  %v2237_v32 = vpop.f32.mrf.mxu3  ;;  %v1973_v53 = vpop.f32.mrf.mxu0 }
 0x363   : > { %v1974_v28 = vadd.f32 %v1973_v53, %v4336_v55  ;;  %v2062_v46 = vpop.f32.mrf.mxu1 }
 0x364   : > { %v2238_v33 = vadd.f32 %v2237_v32, %v2149_v36 }
 0x365   : > { %v2063_v58 = vadd.f32 %v2062_v46, %v1974_v28 }
 0x366   : > { %v2308_v57 = vmax.f32 %v2238_v33, 0.0 }
 0x367   : > { %v2309_v50 = vmax.f32 %v2063_v58, 0.0 }
 0x368   : > { %2372 = vst [vmem:[%s4351_s15 + $0x158] sm:$0xff] %v2308_v57 }
 0x369   : > { %2373 = vst [vmem:[%s4351_s15 + $0x160] sm:$0xff] %v2309_v50  ;;  %v2151_v26 = vpop.f32.mrf.mxu2 }
 0x36a   : > { %v2152_v5 = vadd.f32 %v2151_v26, %v4348_v54  ;;  %v2240_v37 = vpop.f32.mrf.mxu3  ;;  %v1975_v3 = vpop.f32.mrf.mxu0 }
 0x36b   : > { %v1976_v38 = vadd.f32 %v1975_v3, %v4336_v55  ;;  %v2064_v40 = vpop.f32.mrf.mxu1 }
 0x36c   : > { %v2241_v17 = vadd.f32 %v2240_v37, %v2152_v5 }
 0x36d   : > { %v2065_v47 = vadd.f32 %v2064_v40, %v1976_v38 }
 0x36e   : > { %v2310_v48 = vmax.f32 %v2241_v17, 0.0 }
 0x36f   : > { %v2311_v30 = vmax.f32 %v2065_v47, 0.0 }
 0x370   : > { %2374 = vst [vmem:[%s4351_s15 + $0x168] sm:$0xff] %v2310_v48 }
 0x371   : > { %2375 = vst [vmem:[%s4351_s15 + $0x170] sm:$0xff] %v2311_v30  ;;  %v2153_v63 = vpop.f32.mrf.mxu2 }
 0x372   : > { %v2154_v10 = vadd.f32 %v2153_v63, %v4348_v54  ;;  %v2242_v59 = vpop.f32.mrf.mxu3  ;;  %v1978_v62 = vpop.f32.mrf.mxu0 }
 0x373   : > { %v1979_v34 = vadd.f32 %v1978_v62, %v4336_v55  ;;  %v2067_v12 = vpop.f32.mrf.mxu1 }
 0x374   : > { %v2243_v1 = vadd.f32 %v2242_v59, %v2154_v10 }
 0x375   : > { %v2068_v19 = vadd.f32 %v2067_v12, %v1979_v34 }
 0x376   : > { %v2312_v35 = vmax.f32 %v2243_v1, 0.0 }
 0x377   : > { %v2313_v44 = vmax.f32 %v2068_v19, 0.0 }
 0x378   : > { %2376 = vst [vmem:[%s4351_s15 + $0x178] sm:$0xff] %v2312_v35 }
 0x379   : > { %2377 = vst [vmem:[%s4351_s15 + $0x180] sm:$0xff] %v2313_v44  ;;  %v2156_v20 = vpop.f32.mrf.mxu2 }
 0x37a   : > { %v2157_v6 = vadd.f32 %v2156_v20, %v4348_v54  ;;  %v2245_v4 = vpop.f32.mrf.mxu3  ;;  %v1980_v14 = vpop.f32.mrf.mxu0 }
 0x37b   : > { %v1981_v2 = vadd.f32 %v1980_v14, %v4336_v55  ;;  %v2069_v9 = vpop.f32.mrf.mxu1 }
 0x37c   : > { %v2246_v45 = vadd.f32 %v2245_v4, %v2157_v6 }
 0x37d   : > { %v2070_v0 = vadd.f32 %v2069_v9, %v1981_v2 }
 0x37e   : > { %v2314_v42 = vmax.f32 %v2246_v45, 0.0 }
 0x37f   : > { %v2315_v61 = vmax.f32 %v2070_v0, 0.0 }
 0x380   : > { %2378 = vst [vmem:[%s4351_s15 + $0x188] sm:$0xff] %v2314_v42 }
 0x381   : > { %2379 = vst [vmem:[%s4351_s15 + $0x190] sm:$0xff] %v2315_v61  ;;  %v2158_v16 = vpop.f32.mrf.mxu2 }
 0x382   : > { %v2159_v56 = vadd.f32 %v2158_v16, %v4348_v54  ;;  %v2247_v29 = vpop.f32.mrf.mxu3  ;;  %v1983_v25 = vpop.f32.mrf.mxu0 }
 0x383   : > { %v1984_v11 = vadd.f32 %v1983_v25, %v4336_v55  ;;  %v2072_v41 = vpop.f32.mrf.mxu1 }
 0x384   : > { %v2248_v21 = vadd.f32 %v2247_v29, %v2159_v56 }
 0x385   : > { %v2073_v13 = vadd.f32 %v2072_v41, %v1984_v11 }
 0x386   : > { %v2316_v22 = vmax.f32 %v2248_v21, 0.0 }
 0x387   : > { %v2317_v52 = vmax.f32 %v2073_v13, 0.0 }
 0x388   : > { %2380 = vst [vmem:[%s4351_s15 + $0x198] sm:$0xff] %v2316_v22 }
 0x389   : > { %2381 = vst [vmem:[%s4351_s15 + $0x1a0] sm:$0xff] %v2317_v52  ;;  %v2161_v7 = vpop.f32.mrf.mxu2 }
 0x38a   : > { %v2162_v8 = vadd.f32 %v2161_v7, %v4348_v54  ;;  %v2250_v60 = vpop.f32.mrf.mxu3  ;;  %v1985_v15 = vpop.f32.mrf.mxu0 }
 0x38b   : > { %v1986_v31 = vadd.f32 %v1985_v15, %v4336_v55  ;;  %v2074_v49 = vpop.f32.mrf.mxu1 }
 0x38c   : > { %v2251_v23 = vadd.f32 %v2250_v60, %v2162_v8 }
 0x38d   : > { %v2075_v27 = vadd.f32 %v2074_v49, %v1986_v31 }
 0x38e   : > { %v2318_v43 = vmax.f32 %v2251_v23, 0.0 }
 0x38f   : > { %v2319_v39 = vmax.f32 %v2075_v27, 0.0 }
 0x390   : > { %2382 = vst [vmem:[%s4351_s15 + $0x1a8] sm:$0xff] %v2318_v43 }
 0x391   : > { %2383 = vst [vmem:[%s4351_s15 + $0x1b0] sm:$0xff] %v2319_v39  ;;  %v2163_v24 = vpop.f32.mrf.mxu2 }
 0x392   : > { %v2164_v51 = vadd.f32 %v2163_v24, %v4348_v54  ;;  %v2252_v18 = vpop.f32.mrf.mxu3  ;;  %v1988_v36 = vpop.f32.mrf.mxu0 }
 0x393   : > { %v1989_v32 = vadd.f32 %v1988_v36, %v4336_v55  ;;  %v2077_v53 = vpop.f32.mrf.mxu1 }
 0x394   : > { %v2253_v28 = vadd.f32 %v2252_v18, %v2164_v51 }
 0x395   : > { %v2078_v46 = vadd.f32 %v2077_v53, %v1989_v32 }
 0x396   : > { %v2320_v33 = vmax.f32 %v2253_v28, 0.0 }
 0x397   : > { %v2321_v58 = vmax.f32 %v2078_v46, 0.0 }
 0x398   : > { %2384 = vst [vmem:[%s4351_s15 + $0x1b8] sm:$0xff] %v2320_v33 }
 0x399   : > { %2385 = vst [vmem:[%s4351_s15 + $0x1c0] sm:$0xff] %v2321_v58  ;;  %v2166_v57 = vpop.f32.mrf.mxu2 }
 0x39a   : > { %v2167_v50 = vadd.f32 %v2166_v57, %v4348_v54  ;;  %v2255_v26 = vpop.f32.mrf.mxu3  ;;  %v1990_v5 = vpop.f32.mrf.mxu0 }
 0x39b   : > { %v1991_v37 = vadd.f32 %v1990_v5, %v4336_v55  ;;  %v2079_v3 = vpop.f32.mrf.mxu1 }
 0x39c   : > { %v2256_v38 = vadd.f32 %v2255_v26, %v2167_v50 }
 0x39d   : > { %v2080_v40 = vadd.f32 %v2079_v3, %v1991_v37 }
 0x39e   : > { %v2322_v17 = vmax.f32 %v2256_v38, 0.0 }
 0x39f   : > { %v2323_v47 = vmax.f32 %v2080_v40, 0.0 }
 0x3a0   : > { %2386 = vst [vmem:[%s4351_s15 + $0x1c8] sm:$0xff] %v2322_v17 }
 0x3a1   : > { %2387 = vst [vmem:[%s4351_s15 + $0x1d0] sm:$0xff] %v2323_v47  ;;  %v2168_v48 = vpop.f32.mrf.mxu2 }
 0x3a2   : > { %v2169_v30 = vadd.f32 %v2168_v48, %v4348_v54  ;;  %v2257_v63 = vpop.f32.mrf.mxu3  ;;  %v1993_v10 = vpop.f32.mrf.mxu0 }
 0x3a3   : > { %v1994_v59 = vadd.f32 %v1993_v10, %v4336_v55  ;;  %v2082_v62 = vpop.f32.mrf.mxu1 }
 0x3a4   : > { %v2258_v34 = vadd.f32 %v2257_v63, %v2169_v30 }
 0x3a5   : > { %v2083_v12 = vadd.f32 %v2082_v62, %v1994_v59 }
 0x3a6   : > { %v2324_v1 = vmax.f32 %v2258_v34, 0.0 }
 0x3a7   : > { %v2325_v19 = vmax.f32 %v2083_v12, 0.0 }
 0x3a8   : > { %2388 = vst [vmem:[%s4351_s15 + $0x1d8] sm:$0xff] %v2324_v1 }
 0x3a9   : > { %2389 = vst [vmem:[%s4351_s15 + $0x1e0] sm:$0xff] %v2325_v19  ;;  %v2171_v35 = vpop.f32.mrf.mxu2 }
 0x3aa   : > { %v2172_v44 = vadd.f32 %v2171_v35, %v4348_v54  ;;  %v2260_v20 = vpop.f32.mrf.mxu3  ;;  %v1995_v6 = vpop.f32.mrf.mxu0 }
 0x3ab   : > { %v1996_v4 = vadd.f32 %v1995_v6, %v4336_v55  ;;  %v2084_v2 = vpop.f32.mrf.mxu1 }
 0x3ac   : > { %v2261_v14 = vadd.f32 %v2260_v20, %v2172_v44 }
 0x3ad   : > { %v2085_v9 = vadd.f32 %v2084_v2, %v1996_v4 }
 0x3ae   : > { %v2326_v45 = vmax.f32 %v2261_v14, 0.0 }
 0x3af   : > { %v2327_v0 = vmax.f32 %v2085_v9, 0.0 }
 0x3b0   : > { %2390 = vst [vmem:[%s4351_s15 + $0x1e8] sm:$0xff] %v2326_v45 }
 0x3b1   : > { %2391 = vst [vmem:[%s4351_s15 + $0x1f0] sm:$0xff] %v2327_v0  ;;  %v2173_v42 = vpop.f32.mrf.mxu2 }
 0x3b2   : > { %v2174_v61 = vadd.f32 %v2173_v42, %v4348_v54  ;;  %v2262_v55 = vpop.f32.mrf.mxu3 }
 0x3b4   : > { %v2263_v16 = vadd.f32 %v2262_v55, %v2174_v61 }
 0x3b6   : > { %v2328_v56 = vmax.f32 %v2263_v16, 0.0 }
 0x3b8   : > { %2392 = vst [vmem:[%s4351_s15 + $0x1f8] sm:$0xff] %v2328_v56 }
 0x3b9   : > { %3197 = shalt.err (!%p3194_p3)
}
 0x3ba   : > { %s3234_s23 = smov 256   ;;  %s3235_s15 = smov 16  }
 0x3bb   : > { %3129 = dma.vmem_to_hbm [thread:$0]  (%p3314_p5), %s2408_s20, 8192, %s2410_s21, %s2394_s28, %s3234_s23, %s3234_s23, %s3235_s15  }
 0x3bc PF: > { %p3135_p4 = scmp.ge.s32.totalorder %s3232_s27, 2  ;;  %s2424_s17 = sand.u32 1, %s3220_s24  }
 0x3bd   : > { %s2425_s18 = scalar_lea.sflag [#allocation3], %s2424_s17 }
 0x3be   : > { %p3132_p7 = pnand %p3135_p4, %p3318_p6 }
 0x3c0   : > { %p3133_p8 = pneg %p3132_p7 }
 0x3c2   : > { %3215 = dma.done.wait (%p3133_p8), %s2425_s18, 8192  }
 0x3c3   : > { %3217 = vsyncadd (%p3133_p8), %s2425_s18, 4294959104  ;;  %p17_p9 = scmp.ge.s32.totalorder %s3301_s30, 4   ;;  %s4552_s24 = smov %s3224_s25 }
 0x3c4   : > { %s4553_s25 = smov %s3228_s26  ;;  %s4554_s26 = smov %s3312_s10 }
 0x3c5   : > { %s4555_s27 = smov %s3301_s30  ;;  %19 = sbr.rel (!%p17_p9) target bundleno = 3 (0x3), region = 83 }
 0x3ca   :  { %2431 = vsyncpa [#allocation3], 1 }
 0x3cb   :  { %2433 = vsyncpa [#allocation3 + $0x1], 1 }

</bundles_post_ra>
